<compile_context>
chip_gen: v5e
topology: v5e:2x2
jax: 0.10.0
libtpu: 0.0.40
codegen_flags: <defaults>
</compile_context>

<pallas_src>
import jax
import jax.numpy as jnp
from jax.experimental import pallas as pl
from jax.experimental.pallas import tpu as pltpu

HIDDEN1 = 1024
HIDDEN2 = 256
LANE = 128          # TPU lane width; pad K of fc1 and the output dim to this
SUBLANE_BF16 = 16   # bf16 packs 16 rows per vreg sublane group


def _round_up(x, m):
    return ((x + m - 1) // m) * m


def _cdiv(a, b):
    return (a + b - 1) // b


def actor_kernel(x_ref, w1_ref, b1_ref, w2_ref, b2_ref, w3_ref, b3_ref, o_ref):
    # x tile: (TM, k_pad) bf16; weights bf16; biases f32; accumulate in f32.
    x = x_ref[...]
    h1 = jnp.dot(x, w1_ref[...], preferred_element_type=jnp.float32) + b1_ref[...]
    h1 = jnp.maximum(h1, 0.0)
    h2 = jnp.dot(h1.astype(jnp.bfloat16), w2_ref[...],
                 preferred_element_type=jnp.float32) + b2_ref[...]
    h2 = jnp.maximum(h2, 0.0)
    q = jnp.dot(h2.astype(jnp.bfloat16), w3_ref[...],
                preferred_element_type=jnp.float32) + b3_ref[...]
    o_ref[...] = q.astype(o_ref.dtype)


def prepare_params(params):
    """One-time, hoisted param prep (do NOT redo this per forward call):
      * cast weights to bf16 for the MXU (biases stay f32, added after the
        f32-accumulated dot),
      * zero-pad fc1's K (state_dim) up to a multiple of 128,
      * zero-pad the output feature dim (action_dim) up to a multiple of 128
        so stores are unmasked and lane-dense.
    Returns (kernel_params, meta)."""
    w1, b1, w2, b2, w3, b3 = params
    state_dim = w1.shape[0]
    action_dim = w3.shape[1]
    k_pad = _round_up(state_dim, LANE)
    a_pad = _round_up(max(action_dim, LANE), LANE)

    w1p = jnp.zeros((k_pad, HIDDEN1), jnp.bfloat16)
    w1p = w1p.at[:state_dim, :].set(w1.astype(jnp.bfloat16))
    w2b = w2.astype(jnp.bfloat16)
    w3p = jnp.zeros((HIDDEN2, a_pad), jnp.bfloat16)
    w3p = w3p.at[:, :action_dim].set(w3.astype(jnp.bfloat16))
    b1f = jnp.asarray(b1, jnp.float32).reshape(1, HIDDEN1)
    b2f = jnp.asarray(b2, jnp.float32).reshape(1, HIDDEN2)
    b3p = jnp.zeros((1, a_pad), jnp.float32)
    b3p = b3p.at[:, :action_dim].set(jnp.asarray(b3, jnp.float32).reshape(1, -1))

    kernel_params = (w1p, b1f, w2b, b2f, w3p, b3p)
    meta = {"state_dim": state_dim, "action_dim": action_dim,
            "k_pad": k_pad, "a_pad": a_pad}
    return kernel_params, meta


def _choose_tiling(B, tile_m):
    """Pick (TM, n_steps): TM a multiple of 16 and ~<= tile_m, with
    >= 2 grid steps whenever B >= 32 (so v7x megacore gets both cores busy),
    and batch padding bounded by < 16 rows per step."""
    B16 = _round_up(max(B, 1), SUBLANE_BF16)
    n_steps = _cdiv(B16, tile_m)
    if B16 >= 2 * SUBLANE_BF16:
        n_steps = max(n_steps, 2)
    TM = _round_up(_cdiv(B16, n_steps), SUBLANE_BF16)
    n_steps = _cdiv(B16, TM)
    return TM, n_steps


def actor_forward(state, kernel_params, meta, *, tile_m=512):
    """state: (B, state_dim) float32 -> (B, action_dim) float32.
    kernel_params/meta come from prepare_params() (done once, not per call)."""
    w1p, b1f, w2b, b2f, w3p, b3p = kernel_params
    state_dim = meta["state_dim"]
    action_dim = meta["action_dim"]
    k_pad = meta["k_pad"]
    a_pad = meta["a_pad"]

    B = state.shape[0]
    assert state.shape[1] == state_dim

    TM, n_steps = _choose_tiling(B, tile_m)
    B_pad = TM * n_steps

    # Only per-call prep left: cast the state to bf16 and pad rows/cols.
    x = state.astype(jnp.bfloat16)
    x = jnp.pad(x, ((0, B_pad - B), (0, k_pad - state_dim)))

    flops = 2 * B_pad * (k_pad * HIDDEN1 + HIDDEN1 * HIDDEN2 + HIDDEN2 * a_pad)
    bytes_accessed = (
        x.size * 2 + w1p.size * 2 + w2b.size * 2 + w3p.size * 2
        + b1f.size * 4 + b2f.size * 4 + b3p.size * 4
        + B_pad * a_pad * 4
    )

    def resident(shape):
        # Constant index_map -> block stays VMEM-resident across grid steps.
        return pl.BlockSpec(shape, lambda i: (0, 0))

    out = pl.pallas_call(
        actor_kernel,
        out_shape=jax.ShapeDtypeStruct((B_pad, a_pad), jnp.float32),
        grid_spec=pltpu.PrefetchScalarGridSpec(
            num_scalar_prefetch=0,
            grid=(n_steps,),
            in_specs=[
                pl.BlockSpec((TM, k_pad), lambda i: (i, 0)),   # x tile (pipelined)
                resident(w1p.shape),
                resident(b1f.shape),
                resident(w2b.shape),
                resident(b2f.shape),
                resident(w3p.shape),
                resident(b3p.shape),
            ],
            out_specs=pl.BlockSpec((TM, a_pad), lambda i: (i, 0)),
        ),
        compiler_params=pltpu.CompilerParams(
            dimension_semantics=("parallel",),   # batch axis shards across v7x TCs
        ),
        cost_estimate=pl.CostEstimate(
            flops=flops, transcendentals=0, bytes_accessed=bytes_accessed),
    )(x, w1p, b1f, w2b, b2f, w3p, b3p)

    return out[:B, :action_dim]


def init_params(key, state_dim, action_dim):
    """Mirror the PyTorch module: weights ~ N(0, 0.1); biases default
    nn.Linear U(-1/sqrt(fan_in), +1/sqrt(fan_in)).  f32 master copy;
    prepare_params() produces the kernel-ready bf16/padded copies once."""
    ks = jax.random.split(key, 6)

    def linear(kw, kb, fan_in, fan_out):
        w = 0.1 * jax.random.normal(kw, (fan_in, fan_out), dtype=jnp.float32)
        bound = 1.0 / jnp.sqrt(jnp.float32(fan_in))
        b = jax.random.uniform(kb, (1, fan_out), dtype=jnp.float32,
                               minval=-bound, maxval=bound)
        return w, b

    w1, b1 = linear(ks[0], ks[1], state_dim, HIDDEN1)
    w2, b2 = linear(ks[2], ks[3], HIDDEN1, HIDDEN2)
    w3, b3 = linear(ks[4], ks[5], HIDDEN2, action_dim)
    return (w1, b1, w2, b2, w3, b3)


def actor_forward_ref(state, params):
    """Reference with the same bf16 rounding of matmul operands and f32
    accumulation, so the comparison isolates kernel bugs from quantization.
    (Zero-padding of K / output columns contributes exact zeros, so it does
    not need to be mirrored here.)"""
    w1, b1, w2, b2, w3, b3 = params
    bf = lambda a: a.astype(jnp.bfloat16).astype(jnp.float32)
    h1 = jnp.maximum(bf(state) @ bf(w1) + b1, 0.0)
    h2 = jnp.maximum(bf(h1) @ bf(w2) + b2, 0.0)
    return bf(h2) @ bf(w3) + b3


if __name__ == "__main__":
    key = jax.random.PRNGKey(0)
    k_state, k_params = jax.random.split(key)

    batch, state_dim, action_dim = 8, 32, 8
    state = jax.random.normal(k_state, (batch, state_dim), dtype=jnp.float32)
    params = init_params(k_params, state_dim, action_dim)

    # One-time prep (cast/pad weights); reused across every forward call.
    kernel_params, meta = prepare_params(params)
    kernel_params = jax.block_until_ready(kernel_params)

    q = actor_forward(state, kernel_params, meta)
    q = jax.block_until_ready(q)

    q_ref = actor_forward_ref(state, params)
    assert q.shape == (batch, action_dim)
    assert jnp.allclose(q, q_ref, atol=2e-3, rtol=2e-3), "mismatch vs JAX reference"

    print("KERNEL_OK")
</pallas_src>

<mosaic_0001>
module attributes {stable_mosaic.version = 11 : i64} {
  func.func @actor_kernel(%arg0: i32, %arg1: memref<16x128xbf16, #tpu.memory_space<vmem>>, %arg2: memref<128x1024xbf16, #tpu.memory_space<vmem>>, %arg3: memref<1x1024xf32, #tpu.memory_space<vmem>>, %arg4: memref<1024x256xbf16, #tpu.memory_space<vmem>>, %arg5: memref<1x256xf32, #tpu.memory_space<vmem>>, %arg6: memref<256x128xbf16, #tpu.memory_space<vmem>>, %arg7: memref<1x128xf32, #tpu.memory_space<vmem>>, %arg8: memref<16x128xf32, #tpu.memory_space<vmem>>) attributes {dimension_semantics = [#tpu.dimension_semantics<parallel>], iteration_bounds = array<i64: 1>, scalar_prefetch = 0 : i64, scratch_operands = 0 : i64, tpu.core_type = #tpu.core_type<tc>, window_params = [{transform_indices = @transform_0, window_bounds = array<i64: 16, 128>}, {pipeline_mode = #tpu.pipeline_mode<synchronous>, transform_indices = @transform_1, window_bounds = array<i64: 128, 1024>}, {pipeline_mode = #tpu.pipeline_mode<synchronous>, transform_indices = @transform_2, window_bounds = array<i64: 1, 1024>}, {pipeline_mode = #tpu.pipeline_mode<synchronous>, transform_indices = @transform_3, window_bounds = array<i64: 1024, 256>}, {pipeline_mode = #tpu.pipeline_mode<synchronous>, transform_indices = @transform_4, window_bounds = array<i64: 1, 256>}, {pipeline_mode = #tpu.pipeline_mode<synchronous>, transform_indices = @transform_5, window_bounds = array<i64: 256, 128>}, {pipeline_mode = #tpu.pipeline_mode<synchronous>, transform_indices = @transform_6, window_bounds = array<i64: 1, 128>}, {transform_indices = @transform_7, window_bounds = array<i64: 16, 128>}]} {
    %c0 = arith.constant 0 : index
    %c0_0 = arith.constant 0 : index
    %0 = vector.load %arg1[%c0, %c0_0] : memref<16x128xbf16, #tpu.memory_space<vmem>>, vector<16x128xbf16>
    %c0_1 = arith.constant 0 : index
    %c0_2 = arith.constant 0 : index
    %1 = vector.load %arg2[%c0_1, %c0_2] : memref<128x1024xbf16, #tpu.memory_space<vmem>>, vector<128x1024xbf16>
    %cst = arith.constant dense<0.000000e+00> : vector<16x1024xf32>
    %2 = tpu.matmul %0, %1, %cst {dimension_numbers = #tpu.dot_dimension_numbers<[1], [0], [0], [1], [0, 0, 1, 1], [], []>} : vector<16x128xbf16>, vector<128x1024xbf16>, vector<16x1024xf32> -> vector<16x1024xf32>
    %c0_3 = arith.constant 0 : index
    %c0_4 = arith.constant 0 : index
    %3 = vector.load %arg3[%c0_3, %c0_4] : memref<1x1024xf32, #tpu.memory_space<vmem>>, vector<1x1024xf32>
    %4 = vector.broadcast %3 : vector<1x1024xf32> to vector<16x1024xf32>
    %5 = arith.addf %2, %4 : vector<16x1024xf32>
    %cst_5 = arith.constant 0.000000e+00 : f32
    %6 = vector.broadcast %cst_5 : f32 to vector<16x1024xf32>
    %7 = arith.maximumf %5, %6 : vector<16x1024xf32>
    %8 = arith.truncf %7 : vector<16x1024xf32> to vector<16x1024xbf16>
    %c0_6 = arith.constant 0 : index
    %c0_7 = arith.constant 0 : index
    %9 = vector.load %arg4[%c0_6, %c0_7] : memref<1024x256xbf16, #tpu.memory_space<vmem>>, vector<1024x256xbf16>
    %cst_8 = arith.constant dense<0.000000e+00> : vector<16x256xf32>
    %10 = tpu.matmul %8, %9, %cst_8 {dimension_numbers = #tpu.dot_dimension_numbers<[1], [0], [0], [1], [0, 0, 1, 1], [], []>} : vector<16x1024xbf16>, vector<1024x256xbf16>, vector<16x256xf32> -> vector<16x256xf32>
    %c0_9 = arith.constant 0 : index
    %c0_10 = arith.constant 0 : index
    %11 = vector.load %arg5[%c0_9, %c0_10] : memref<1x256xf32, #tpu.memory_space<vmem>>, vector<1x256xf32>
    %12 = vector.broadcast %11 : vector<1x256xf32> to vector<16x256xf32>
    %13 = arith.addf %10, %12 : vector<16x256xf32>
    %cst_11 = arith.constant 0.000000e+00 : f32
    %14 = vector.broadcast %cst_11 : f32 to vector<16x256xf32>
    %15 = arith.maximumf %13, %14 : vector<16x256xf32>
    %16 = arith.truncf %15 : vector<16x256xf32> to vector<16x256xbf16>
    %c0_12 = arith.constant 0 : index
    %c0_13 = arith.constant 0 : index
    %17 = vector.load %arg6[%c0_12, %c0_13] : memref<256x128xbf16, #tpu.memory_space<vmem>>, vector<256x128xbf16>
    %cst_14 = arith.constant dense<0.000000e+00> : vector<16x128xf32>
    %18 = tpu.matmul %16, %17, %cst_14 {dimension_numbers = #tpu.dot_dimension_numbers<[1], [0], [0], [1], [0, 0, 1, 1], [], []>} : vector<16x256xbf16>, vector<256x128xbf16>, vector<16x128xf32> -> vector<16x128xf32>
    %c0_15 = arith.constant 0 : index
    %c0_16 = arith.constant 0 : index
    %19 = vector.load %arg7[%c0_15, %c0_16] : memref<1x128xf32, #tpu.memory_space<vmem>>, vector<1x128xf32>
    %20 = vector.broadcast %19 : vector<1x128xf32> to vector<16x128xf32>
    %21 = arith.addf %18, %20 : vector<16x128xf32>
    %c0_17 = arith.constant 0 : index
    %c0_18 = arith.constant 0 : index
    %22 = vector.load %arg8[%c0_17, %c0_18] : memref<16x128xf32, #tpu.memory_space<vmem>>, vector<16x128xf32>
    tpu.vector_store %arg8[%c0_17, %c0_18], %21 {strides = array<i32>} : memref<16x128xf32, #tpu.memory_space<vmem>>, vector<16x128xf32>,
    return
  }
  func.func @transform_0(%arg0: i32) -> (i32, i32) {
    %c0_i32 = arith.constant 0 : i32
    %c0_i32_0 = arith.constant 0 : i32
    return %arg0, %c0_i32 : i32, i32
  }
  func.func @transform_1(%arg0: i32) -> (i32, i32) {
    %c0_i32 = arith.constant 0 : i32
    %c0_i32_0 = arith.constant 0 : i32
    %c0_i32_1 = arith.constant 0 : i32
    return %c0_i32, %c0_i32_0 : i32, i32
  }
  func.func @transform_2(%arg0: i32) -> (i32, i32) {
    %c0_i32 = arith.constant 0 : i32
    %c0_i32_0 = arith.constant 0 : i32
    %c0_i32_1 = arith.constant 0 : i32
    return %c0_i32, %c0_i32_0 : i32, i32
  }
  func.func @transform_3(%arg0: i32) -> (i32, i32) {
    %c0_i32 = arith.constant 0 : i32
    %c0_i32_0 = arith.constant 0 : i32
    %c0_i32_1 = arith.constant 0 : i32
    return %c0_i32, %c0_i32_0 : i32, i32
  }
  func.func @transform_4(%arg0: i32) -> (i32, i32) {
    %c0_i32 = arith.constant 0 : i32
    %c0_i32_0 = arith.constant 0 : i32
    %c0_i32_1 = arith.constant 0 : i32
    return %c0_i32, %c0_i32_0 : i32, i32
  }
  func.func @transform_5(%arg0: i32) -> (i32, i32) {
    %c0_i32 = arith.constant 0 : i32
    %c0_i32_0 = arith.constant 0 : i32
    %c0_i32_1 = arith.constant 0 : i32
    return %c0_i32, %c0_i32_0 : i32, i32
  }
  func.func @transform_6(%arg0: i32) -> (i32, i32) {
    %c0_i32 = arith.constant 0 : i32
    %c0_i32_0 = arith.constant 0 : i32
    %c0_i32_1 = arith.constant 0 : i32
    return %c0_i32, %c0_i32_0 : i32, i32
  }
  func.func @transform_7(%arg0: i32) -> (i32, i32) {
    %c0_i32 = arith.constant 0 : i32
    %c0_i32_0 = arith.constant 0 : i32
    return %arg0, %c0_i32 : i32, i32
  }
}

</mosaic_0001>

<bundles_post_ra>
// kernel: tpu_custom_call.1
= control target key start
LH: loop header
LB: loop body
LE: loop exit
PB: predicated region body
PF: predicated region fallthrough
CT: control target
= control target key end

     0   :  { %12 = vsyncpa [#allocation3], 0  ;;  %s3184_s0 = inlined_call_operand.hbm [shape: bf16[16,128], index: 0, kind: input, shape index: {}]   ;;  %s3185_s1 = inlined_call_operand.hbm [shape: bf16[128,1024], index: 1, kind: input, shape index: {}]   ;;  %s3186_s2 = inlined_call_operand.hbm [shape: f32[1,1024], index: 2, kind: input, shape index: {}]   ;;  %s3187_s3 = inlined_call_operand.hbm [shape: bf16[1024,256], index: 3, kind: input, shape index: {}]   ;;  %s3188_s4 = inlined_call_operand.vmem [shape: f32[1,256], index: 4, kind: input, shape index: {}]   ;;  %s3189_s5 = inlined_call_operand.hbm [shape: bf16[256,128], index: 5, kind: input, shape index: {}]   ;;  %s3190_s6 = inlined_call_operand.vmem [shape: f32[1,128], index: 6, kind: input, shape index: {}]   ;;  %s3191_s7 = inlined_call_operand.hbm [shape: f32[16,128], index: 7, kind: output, shape index: {}]  }
   0x1   :  { %13 = vsyncpa [#allocation6], 0 }
   0x2   :  { %14 = vsyncpa [#allocation9], 0  ;;  %s33_s26 = sshll.u32 %s3185_s1, 4  ;;  %s34_s26 = int_to_ptr.hbm [resolvable:$true] %s33_s26 }
   0x3   :  { %15 = vsyncpa [#allocation4], 0  ;;  %s3046_s27 = smov [#allocation5]   ;;  %s57_s8 = sshll.u32 %s3187_s3, 4  ;;  %s58_s8 = int_to_ptr.hbm [resolvable:$true] %s57_s8 }
   0x4   :  { %s35_s28 = sshll.u32 %s3046_s27, 4  ;;  %s3047_s9 = smov 512   ;;  %s36_s28 = int_to_ptr.vmem [resolvable:$true] %s35_s28 }
   0x5   :  { %s3048_s10 = smov 32   ;;  %s3049_s11 = smov [#allocation8]  }
   0x6   :  { %41 = dma.hbm_to_vmem [thread:$0]  %s34_s26, 8192, %s36_s28, [#allocation6], %s3047_s9, %s3047_s9, %s3048_s10  }
   0x7   :  { %s59_s12 = sshll.u32 %s3049_s11, 4  ;;  %s3050_s13 = smov 128   ;;  %s60_s12 = int_to_ptr.vmem [resolvable:$true] %s59_s12 }
   0x8   :  { %s3051_s14 = smov 8   ;;  %s20_s16 = sshll.u32 %s3184_s0, 4  ;;  %s21_s16 = int_to_ptr.hbm [resolvable:$true] %s20_s16 }
   0x9   :  { %65 = dma.hbm_to_vmem [thread:$0]  %s58_s8, 16384, %s60_s12, [#allocation9], %s3050_s13, %s3050_s13, %s3051_s14  }
   0xa   :  { %s3052_s17 = smov [#allocation2]   ;;  %s47_s20 = sshll.u32 %s3186_s2, 4  ;;  %s48_s20 = int_to_ptr.hbm [resolvable:$true] %s47_s20 }
   0xb   :  { %s22_s3 = sshll.u32 %s3052_s17, 4  ;;  %s3053_s21 = smov 64   ;;  %s23_s3 = int_to_ptr.vmem [resolvable:$true] %s22_s3 }
   0xc   :  { %s3054_s22 = smov 4   ;;  %s3055_s23 = smov [#allocation7]  }
   0xd   :  { %28 = dma.hbm_to_vmem [thread:$0]  %s21_s16, 128, %s23_s3, [#allocation3], %s3053_s21, %s3053_s21, %s3054_s22  }
   0xe   :  { %s49_s24 = sshll.u32 %s3055_s23, 4  ;;  %s72_s27 = sshll.u32 %s3189_s5, 4  ;;  %s50_s24 = int_to_ptr.vmem [resolvable:$true] %s49_s24  ;;  %s73_s27 = int_to_ptr.hbm [resolvable:$true] %s72_s27 }
   0xf   :  { %52 = dma.hbm_to_vmem [thread:$0]  %s48_s20, 128, %s50_s24, [#allocation6]  }
  0x10   :  { %s3056_s0 = smov [#allocation10]  }
  0x11   :  { %s74_s28 = sshll.u32 %s3056_s0, 4  ;;  %s75_s28 = int_to_ptr.vmem [resolvable:$true] %s74_s28 }
  0x12   :  { %80 = dma.hbm_to_vmem [thread:$0]  %s73_s27, 2048, %s75_s28, [#allocation9], %s3053_s21, %s3053_s21, %s3054_s22  }
  0x13   :  { %3038 = dma.done.wait [#allocation3], 128  }
  0x14   :  { %3039 = vsyncadd [#allocation3], 4294967168 }
  0x15   :  { %3040 = dma.done.wait [#allocation6], 8320  }
  0x16   :  { %3041 = vsyncadd [#allocation6], 4294958976 }
  0x17   :  { %3042 = dma.done.wait [#allocation9], 18432  }
  0x18   :  { %3043 = vsyncadd [#allocation9], 4294948864  ;;  %v2066_v0 = vld [vmem:[#allocation5 + $0x1c0] sm:$0xf]  ;;  %v2729_v2 = vld [vmem:[#allocation5 + $0x1c4] sm:$0xf] }
  0x19   :  { %v2733_v1 = vld [vmem:[#allocation5 + $0x1dc] sm:$0xf0]  ;;  %v2068_v4 = vld [vmem:[#allocation5 + $0x1e0] sm:$0xf0]  ;;  %v2074_v5 = vld [vmem:[#allocation5 + $0x1c8] sm:$0xf] }
  0x1a   :  { %v2067_v3 = vor.u32 %v2733_v1, %v2066_v0  ;;  %v2734_v6 = vld [vmem:[#allocation5 + $0x1e4] sm:$0xf0]  ;;  %v2071_v7 = vor.u32 %v2729_v2, %v2068_v4  ;;  %v2730_v9 = vld [vmem:[#allocation5 + $0x1cc] sm:$0xf]  ;;  %v2034_v11 = vld [vmem:[#allocation5 + $0x180] sm:$0xf] }
  0x1b   :  { %v2075_v8 = vor.u32 %v2734_v6, %v2074_v5  ;;  %v2076_v10 = vld [vmem:[#allocation5 + $0x1e8] sm:$0xf0]  ;;  %v2725_v13 = vld [vmem:[#allocation5 + $0x19c] sm:$0xf0]  ;;  %v2721_v14 = vld [vmem:[#allocation5 + $0x184] sm:$0xf] }
  0x1c   :  { %513 = vmatpush.bf16.msra.mxu0 %v2067_v3  ;;  %v2079_v12 = vor.u32 %v2730_v9, %v2076_v10  ;;  %v2036_v15 = vld [vmem:[#allocation5 + $0x1a0] sm:$0xf0]  ;;  %527 = vmatpush.bf16.msra.mxu1 %v2071_v7  ;;  %v2035_v16 = vor.u32 %v2725_v13, %v2034_v11  ;;  %v2042_v18 = vld [vmem:[#allocation5 + $0x188] sm:$0xf]  ;;  %v2722_v20 = vld [vmem:[#allocation5 + $0x18c] sm:$0xf] }
  0x1d   :  { %541 = vmatpush.bf16.msra.mxu2 %v2075_v8  ;;  %v2039_v17 = vor.u32 %v2721_v14, %v2036_v15  ;;  %v2726_v19 = vld [vmem:[#allocation5 + $0x1a4] sm:$0xf0]  ;;  %v2044_v22 = vld [vmem:[#allocation5 + $0x1a8] sm:$0xf0]  ;;  %v2002_v23 = vld [vmem:[#allocation5 + $0x140] sm:$0xf] }
  0x1e   :  { %555 = vmatpush.bf16.msra.mxu3 %v2079_v12  ;;  %v2043_v21 = vor.u32 %v2726_v19, %v2042_v18  ;;  %v2717_v24 = vld [vmem:[#allocation5 + $0x15c] sm:$0xf0]  ;;  %v2047_v25 = vor.u32 %v2722_v20, %v2044_v22  ;;  %v2713_v26 = vld [vmem:[#allocation5 + $0x144] sm:$0xf]  ;;  %v2010_v28 = vld [vmem:[#allocation5 + $0x148] sm:$0xf] }
  0x1f   :  { %v2004_v27 = vld [vmem:[#allocation5 + $0x160] sm:$0xf0]  ;;  %v2003_v29 = vor.u32 %v2717_v24, %v2002_v23  ;;  %v2718_v30 = vld [vmem:[#allocation5 + $0x164] sm:$0xf0]  ;;  %v2714_v31 = vld [vmem:[#allocation5 + $0x14c] sm:$0xf] }
  0x20   :  { %514 = vmatpush.bf16.msra.mxu0 %v2035_v16  ;;  %v2012_v32 = vld [vmem:[#allocation5 + $0x168] sm:$0xf0]  ;;  %528 = vmatpush.bf16.msra.mxu1 %v2039_v17  ;;  %v2007_v33 = vor.u32 %v2713_v26, %v2004_v27  ;;  %v2011_v34 = vor.u32 %v2718_v30, %v2010_v28  ;;  %v1970_v35 = vld [vmem:[#allocation5 + $0x100] sm:$0xf]  ;;  %v2705_v37 = vld [vmem:[#allocation5 + $0x104] sm:$0xf] }
  0x21   :  { %542 = vmatpush.bf16.msra.mxu2 %v2043_v21  ;;  %v2709_v36 = vld [vmem:[#allocation5 + $0x11c] sm:$0xf0]  ;;  %v2015_v38 = vor.u32 %v2714_v31, %v2012_v32  ;;  %v1972_v39 = vld [vmem:[#allocation5 + $0x120] sm:$0xf0]  ;;  %v1978_v40 = vld [vmem:[#allocation5 + $0x108] sm:$0xf] }
  0x22   :  { %556 = vmatpush.bf16.msra.mxu3 %v2047_v25  ;;  %v2710_v41 = vld [vmem:[#allocation5 + $0x124] sm:$0xf0]  ;;  %v2706_v42 = vld [vmem:[#allocation5 + $0x10c] sm:$0xf]  ;;  %v1971_v44 = vor.u32 %v2709_v36, %v1970_v35  ;;  %v1975_v45 = vor.u32 %v2705_v37, %v1972_v39  ;;  %v1938_v47 = vld [vmem:[#allocation5 + $0xc0] sm:$0xf] }
  0x23   :  { %v1980_v43 = vld [vmem:[#allocation5 + $0x128] sm:$0xf0]  ;;  %v1979_v46 = vor.u32 %v2710_v41, %v1978_v40  ;;  %v2701_v48 = vld [vmem:[#allocation5 + $0xdc] sm:$0xf0]  ;;  %v2697_v49 = vld [vmem:[#allocation5 + $0xc4] sm:$0xf] }
  0x24   :  { %515 = vmatpush.bf16.msra.mxu0 %v2003_v29  ;;  %529 = vmatpush.bf16.msra.mxu1 %v2007_v33  ;;  %v1983_v50 = vor.u32 %v2706_v42, %v1980_v43  ;;  %v1940_v51 = vld [vmem:[#allocation5 + $0xe0] sm:$0xf0]  ;;  %v1946_v52 = vld [vmem:[#allocation5 + $0xc8] sm:$0xf]  ;;  %v2698_v54 = vld [vmem:[#allocation5 + $0xcc] sm:$0xf]  ;;  %v1939_v56 = vor.u32 %v2701_v48, %v1938_v47 }
  0x25   :  { %543 = vmatpush.bf16.msra.mxu2 %v2011_v34  ;;  %v2702_v53 = vld [vmem:[#allocation5 + $0xe4] sm:$0xf0]  ;;  %v1948_v55 = vld [vmem:[#allocation5 + $0xe8] sm:$0xf0]  ;;  %v1943_v57 = vor.u32 %v2697_v49, %v1940_v51  ;;  %v1906_v59 = vld [vmem:[#allocation5 + $0x80] sm:$0xf] }
  0x26   :  { %557 = vmatpush.bf16.msra.mxu3 %v2015_v38  ;;  %v1947_v58 = vor.u32 %v2702_v53, %v1946_v52  ;;  %v2693_v60 = vld [vmem:[#allocation5 + $0x9c] sm:$0xf0]  ;;  %v2689_v61 = vld [vmem:[#allocation5 + $0x84] sm:$0xf]  ;;  %v1951_v62 = vor.u32 %v2698_v54, %v1948_v55  ;;  %v1914_v0 = vld [vmem:[#allocation5 + $0x88] sm:$0xf] }
  0x27   :  { %v1908_v63 = vld [vmem:[#allocation5 + $0xa0] sm:$0xf0]  ;;  %v2694_v1 = vld [vmem:[#allocation5 + $0xa4] sm:$0xf0]  ;;  %v2690_v2 = vld [vmem:[#allocation5 + $0x8c] sm:$0xf]  ;;  %v1907_v4 = vor.u32 %v2693_v60, %v1906_v59 }
  0x28   :  { %516 = vmatpush.bf16.msra.mxu0 %v1971_v44  ;;  %530 = vmatpush.bf16.msra.mxu1 %v1975_v45  ;;  %v1916_v3 = vld [vmem:[#allocation5 + $0xa8] sm:$0xf0]  ;;  %v1911_v5 = vor.u32 %v2689_v61, %v1908_v63  ;;  %v1915_v6 = vor.u32 %v2694_v1, %v1914_v0  ;;  %v1874_v7 = vld [vmem:[#allocation5 + $0x40] sm:$0xf]  ;;  %v2681_v9 = vld [vmem:[#allocation5 + $0x44] sm:$0xf] }
  0x29   :  { %544 = vmatpush.bf16.msra.mxu2 %v1979_v46  ;;  %v2685_v8 = vld [vmem:[#allocation5 + $0x5c] sm:$0xf0]  ;;  %v1919_v10 = vor.u32 %v2690_v2, %v1916_v3  ;;  %v1876_v11 = vld [vmem:[#allocation5 + $0x60] sm:$0xf0]  ;;  %v1882_v12 = vld [vmem:[#allocation5 + $0x48] sm:$0xf] }
  0x2a   :  { %558 = vmatpush.bf16.msra.mxu3 %v1983_v50  ;;  %v2686_v13 = vld [vmem:[#allocation5 + $0x64] sm:$0xf0]  ;;  %v2682_v14 = vld [vmem:[#allocation5 + $0x4c] sm:$0xf]  ;;  %v1875_v16 = vor.u32 %v2685_v8, %v1874_v7  ;;  %v1842_v17 = vld [vmem:[#allocation5] sm:$0xf]  ;;  %v1879_v19 = vor.u32 %v2681_v9, %v1876_v11 }
  0x2b   :  { %v1884_v15 = vld [vmem:[#allocation5 + $0x68] sm:$0xf0]  ;;  %v2677_v18 = vld [vmem:[#allocation5 + $0x1c] sm:$0xf0]  ;;  %v1883_v20 = vor.u32 %v2686_v13, %v1882_v12  ;;  %v2673_v21 = vld [vmem:[#allocation5 + $0x4] sm:$0xf] }
  0x2c   :  { %517 = vmatpush.bf16.msra.mxu0 %v1939_v56  ;;  %531 = vmatpush.bf16.msra.mxu1 %v1943_v57  ;;  %v1844_v22 = vld [vmem:[#allocation5 + $0x20] sm:$0xf0]  ;;  %v1850_v23 = vld [vmem:[#allocation5 + $0x8] sm:$0xf]  ;;  %v1887_v24 = vor.u32 %v2682_v14, %v1884_v15  ;;  %v2674_v26 = vld [vmem:[#allocation5 + $0xc] sm:$0xf]  ;;  %v1843_v31 = vor.u32 %v2677_v18, %v1842_v17 }
  0x2d   :  { %545 = vmatpush.bf16.msra.mxu2 %v1947_v58  ;;  %v2678_v25 = vld [vmem:[#allocation5 + $0x24] sm:$0xf0]  ;;  %v1852_v27 = vld [vmem:[#allocation5 + $0x28] sm:$0xf0]  ;;  %v2082_v28 = vld [vmem:[#allocation5 + $0x1d0] sm:$0xf]  ;;  %v1847_v35 = vor.u32 %v2673_v21, %v1844_v22 }
  0x2e   :  { %559 = vmatpush.bf16.msra.mxu3 %v1951_v62  ;;  %v2735_v29 = vld [vmem:[#allocation5 + $0x1ec] sm:$0xf0]  ;;  %v2731_v30 = vld [vmem:[#allocation5 + $0x1d4] sm:$0xf]  ;;  %v2090_v33 = vld [vmem:[#allocation5 + $0x1d8] sm:$0xf]  ;;  %v1851_v36 = vor.u32 %v2678_v25, %v1850_v23  ;;  %v1855_v39 = vor.u32 %v2674_v26, %v1852_v27 }
  0x2f   :  { %v2084_v32 = vld [vmem:[#allocation5 + $0x1f0] sm:$0xf0]  ;;  %v2736_v34 = vld [vmem:[#allocation5 + $0x1f4] sm:$0xf0]  ;;  %v2732_v37 = vld [vmem:[#allocation5 + $0x1dc] sm:$0xf]  ;;  %v2083_v40 = vor.u32 %v2735_v29, %v2082_v28 }
  0x30   :  { %518 = vmatpush.bf16.msra.mxu0 %v1907_v4  ;;  %532 = vmatpush.bf16.msra.mxu1 %v1911_v5  ;;  %v2092_v38 = vld [vmem:[#allocation5 + $0x1f8] sm:$0xf0]  ;;  %v2087_v42 = vor.u32 %v2731_v30, %v2084_v32  ;;  %v2091_v43 = vor.u32 %v2736_v34, %v2090_v33  ;;  %v2050_v44 = vld [vmem:[#allocation5 + $0x190] sm:$0xf]  ;;  %v2723_v46 = vld [vmem:[#allocation5 + $0x194] sm:$0xf] }
  0x31   :  { %546 = vmatpush.bf16.msra.mxu2 %v1915_v6  ;;  %v3116_v41 = vld [vmem:[#allocation2] sm:$0xff]  ;;  %v2727_v45 = vld [vmem:[#allocation5 + $0x1ac] sm:$0xf0]  ;;  %v2095_v47 = vor.u32 %v2732_v37, %v2092_v38  ;;  %v2052_v48 = vld [vmem:[#allocation5 + $0x1b0] sm:$0xf0]  ;;  %s3057_s30 = smov [#allocation11]  }
  0x32   :  { %560 = vmatpush.bf16.msra.mxu3 %v1919_v10  ;;  %v2058_v49 = vld [vmem:[#allocation5 + $0x198] sm:$0xf]  ;;  %v2724_v51 = vld [vmem:[#allocation5 + $0x19c] sm:$0xf]  ;;  %v2051_v53 = vor.u32 %v2727_v45, %v2050_v44  ;;  %v2055_v54 = vor.u32 %v2723_v46, %v2052_v48  ;;  %v2018_v56 = vld [vmem:[#allocation5 + $0x150] sm:$0xf] }
  0x33   :  { %v2728_v50 = vld [vmem:[#allocation5 + $0x1b4] sm:$0xf0]  ;;  %v2060_v52 = vld [vmem:[#allocation5 + $0x1b8] sm:$0xf0]  ;;  %v2719_v57 = vld [vmem:[#allocation5 + $0x16c] sm:$0xf0] }
  0x34   :  { %519 = vmatpush.bf16.msra.mxu0 %v1875_v16  ;;  %533 = vmatpush.bf16.msra.mxu1 %v1879_v19  ;;  %v2059_v55 = vor.u32 %v2728_v50, %v2058_v49  ;;  %v2715_v58 = vld [vmem:[#allocation5 + $0x154] sm:$0xf]  ;;  %v2063_v59 = vor.u32 %v2724_v51, %v2060_v52  ;;  %v2026_v61 = vld [vmem:[#allocation5 + $0x158] sm:$0xf]  ;;  %v2716_v63 = vld [vmem:[#allocation5 + $0x15c] sm:$0xf]  ;;  %v2019_v1 = vor.u32 %v2719_v57, %v2018_v56 }
  0x35   :  { %547 = vmatpush.bf16.msra.mxu2 %v1883_v20  ;;  %v2020_v60 = vld [vmem:[#allocation5 + $0x170] sm:$0xf0]  ;;  %v2720_v62 = vld [vmem:[#allocation5 + $0x174] sm:$0xf0]  ;;  %v2028_v0 = vld [vmem:[#allocation5 + $0x178] sm:$0xf0] }
  0x36   :  { %561 = vmatpush.bf16.msra.mxu3 %v1887_v24  ;;  %v2023_v2 = vor.u32 %v2715_v58, %v2020_v60  ;;  %v2027_v3 = vor.u32 %v2720_v62, %v2026_v61  ;;  %v1986_v4 = vld [vmem:[#allocation5 + $0x110] sm:$0xf]  ;;  %v2707_v6 = vld [vmem:[#allocation5 + $0x114] sm:$0xf]  ;;  %v2031_v7 = vor.u32 %v2716_v63, %v2028_v0  ;;  %v1994_v9 = vld [vmem:[#allocation5 + $0x118] sm:$0xf] }
  0x37   :  { %v2711_v5 = vld [vmem:[#allocation5 + $0x12c] sm:$0xf0]  ;;  %v1988_v8 = vld [vmem:[#allocation5 + $0x130] sm:$0xf0]  ;;  %v2712_v10 = vld [vmem:[#allocation5 + $0x134] sm:$0xf0] }
  0x38   :  { %520 = vmatpush.bf16.msra.mxu0 %v1843_v31  ;;  %534 = vmatpush.bf16.msra.mxu1 %v1847_v35  ;;  %v2708_v11 = vld [vmem:[#allocation5 + $0x11c] sm:$0xf]  ;;  %v1987_v13 = vor.u32 %v2711_v5, %v1986_v4  ;;  %v1991_v14 = vor.u32 %v2707_v6, %v1988_v8  ;;  %v1995_v15 = vor.u32 %v2712_v10, %v1994_v9  ;;  %v1954_v16 = vld [vmem:[#allocation5 + $0xd0] sm:$0xf]  ;;  %v2699_v18 = vld [vmem:[#allocation5 + $0xd4] sm:$0xf] }
  0x39   :  { %548 = vmatpush.bf16.msra.mxu2 %v1851_v36  ;;  %v1996_v12 = vld [vmem:[#allocation5 + $0x138] sm:$0xf0]  ;;  %v2703_v17 = vld [vmem:[#allocation5 + $0xec] sm:$0xf0]  ;;  %v1956_v20 = vld [vmem:[#allocation5 + $0xf0] sm:$0xf0] }
  0x3a   :  { %562 = vmatpush.bf16.msra.mxu3 %v1855_v39  ;;  %v1999_v19 = vor.u32 %v2708_v11, %v1996_v12  ;;  %v1962_v21 = vld [vmem:[#allocation5 + $0xd8] sm:$0xf]  ;;  %v2700_v23 = vld [vmem:[#allocation5 + $0xdc] sm:$0xf]  ;;  %v1955_v25 = vor.u32 %v2703_v17, %v1954_v16  ;;  %v1959_v26 = vor.u32 %v2699_v18, %v1956_v20  ;;  %v1922_v28 = vld [vmem:[#allocation5 + $0x90] sm:$0xf] }
  0x3b   :  { %521 = vmatmul.bf16.vlgmr.msra.gmra.mxu0 %v3116_v41  ;;  %535 = vmatmul.bf16.vlgmr.msra.gmra.mxu1 %v3116_v41  ;;  %v2704_v22 = vld [vmem:[#allocation5 + $0xf4] sm:$0xf0]  ;;  %v1964_v24 = vld [vmem:[#allocation5 + $0xf8] sm:$0xf0]  ;;  %v2695_v29 = vld [vmem:[#allocation5 + $0xac] sm:$0xf0] }
  0x3c   :  { %569 = vmatpush.bf16.msrb.mxu0 %v2083_v40  ;;  %583 = vmatpush.bf16.msrb.mxu1 %v2087_v42  ;;  %v1963_v27 = vor.u32 %v2704_v22, %v1962_v21  ;;  %v2691_v30 = vld [vmem:[#allocation5 + $0x94] sm:$0xf]  ;;  %v1967_v31 = vor.u32 %v2700_v23, %v1964_v24  ;;  %v1930_v33 = vld [vmem:[#allocation5 + $0x98] sm:$0xf]  ;;  %v2692_v35 = vld [vmem:[#allocation5 + $0x9c] sm:$0xf]  ;;  %v1923_v37 = vor.u32 %v2695_v29, %v1922_v28 }
  0x3d   :  { %597 = vmatpush.bf16.msrb.mxu2 %v2091_v43  ;;  %563 = vmatmul.bf16.vlgmr.msra.gmra.mxu3 %v3116_v41  ;;  %v1924_v32 = vld [vmem:[#allocation5 + $0xb0] sm:$0xf0]  ;;  %v2696_v34 = vld [vmem:[#allocation5 + $0xb4] sm:$0xf0]  ;;  %v1932_v36 = vld [vmem:[#allocation5 + $0xb8] sm:$0xf0] }
  0x3e   :  { %611 = vmatpush.bf16.msrb.mxu3 %v2095_v47  ;;  %549 = vmatmul.bf16.vlgmr.msra.gmra.mxu2 %v3116_v41  ;;  %v1927_v38 = vor.u32 %v2691_v30, %v1924_v32  ;;  %v1931_v39 = vor.u32 %v2696_v34, %v1930_v33  ;;  %v1890_v40 = vld [vmem:[#allocation5 + $0x50] sm:$0xf]  ;;  %v2683_v43 = vld [vmem:[#allocation5 + $0x54] sm:$0xf]  ;;  %v1935_v44 = vor.u32 %v2692_v35, %v1932_v36  ;;  %v1898_v46 = vld [vmem:[#allocation5 + $0x58] sm:$0xf] }
  0x3f   :  { %v2687_v42 = vld [vmem:[#allocation5 + $0x6c] sm:$0xf0]  ;;  %v1892_v45 = vld [vmem:[#allocation5 + $0x70] sm:$0xf0]  ;;  %v2688_v47 = vld [vmem:[#allocation5 + $0x74] sm:$0xf0] }
  0x40   :  { %570 = vmatpush.bf16.msrb.mxu0 %v2051_v53  ;;  %584 = vmatpush.bf16.msrb.mxu1 %v2055_v54  ;;  %v2684_v48 = vld [vmem:[#allocation5 + $0x5c] sm:$0xf]  ;;  %v1891_v50 = vor.u32 %v2687_v42, %v1890_v40  ;;  %v1858_v51 = vld [vmem:[#allocation5 + $0x10] sm:$0xf]  ;;  %v1895_v52 = vor.u32 %v2683_v43, %v1892_v45  ;;  %v1899_v53 = vor.u32 %v2688_v47, %v1898_v46  ;;  %v1860_v56 = vld [vmem:[#allocation5 + $0x30] sm:$0xf0] }
  0x41   :  { %598 = vmatpush.bf16.msrb.mxu2 %v2059_v55  ;;  %v1900_v49 = vld [vmem:[#allocation5 + $0x78] sm:$0xf0]  ;;  %v2679_v54 = vld [vmem:[#allocation5 + $0x2c] sm:$0xf0]  ;;  %v2675_v55 = vld [vmem:[#allocation5 + $0x14] sm:$0xf] }
  0x42   :  { %612 = vmatpush.bf16.msrb.mxu3 %v2063_v59  ;;  %v1903_v57 = vor.u32 %v2684_v48, %v1900_v49  ;;  %v1866_v58 = vld [vmem:[#allocation5 + $0x18] sm:$0xf]  ;;  %v2676_v60 = vld [vmem:[#allocation5 + $0x1c] sm:$0xf]  ;;  %v2752_v63 = vld [vmem:[#allocation8 + $0x74] sm:$0xf0]  ;;  %v1859_v0 = vor.u32 %v2679_v54, %v1858_v51 }
  0x43   :  { %v2680_v59 = vld [vmem:[#allocation5 + $0x34] sm:$0xf0]  ;;  %v1868_v61 = vld [vmem:[#allocation5 + $0x38] sm:$0xf0]  ;;  %v2784_v9 = vld [vmem:[#allocation8 + $0x174] sm:$0xf0] }
  0x44   :  { %571 = vmatpush.bf16.msrb.mxu0 %v2019_v1  ;;  %585 = vmatpush.bf16.msrb.mxu1 %v2023_v2  ;;  %v2154_v62 = vld [vmem:[#allocation8 + $0x70] sm:$0xf]  ;;  %v2768_v2 = vld [vmem:[#allocation8 + $0xf4] sm:$0xf0]  ;;  %v1867_v4 = vor.u32 %v2680_v59, %v1866_v58  ;;  %v1871_v5 = vor.u32 %v2676_v60, %v1868_v61  ;;  %v2750_v11 = vld [vmem:[#allocation8 + $0x64] sm:$0xf0] }
  0x45   :  { %599 = vmatpush.bf16.msrb.mxu2 %v2027_v3  ;;  %v2218_v1 = vld [vmem:[#allocation8 + $0xf0] sm:$0xf]  ;;  %v1863_v3 = vor.u32 %v2675_v55, %v1860_v56  ;;  %v2155_v6 = vor.u32 %v2752_v63, %v2154_v62  ;;  %v2274_v20 = vld [vmem:[#allocation8 + $0x160] sm:$0xf]  ;;  %v2782_v21 = vld [vmem:[#allocation8 + $0x164] sm:$0xf0] }
  0x46   :  { %613 = vmatpush.bf16.msrb.mxu3 %v2031_v7  ;;  %v2146_v7 = vld [vmem:[#allocation8 + $0x60] sm:$0xf]  ;;  %v2282_v8 = vld [vmem:[#allocation8 + $0x170] sm:$0xf]  ;;  %v2219_v10 = vor.u32 %v2768_v2, %v2218_v1  ;;  %v2748_v23 = vld [vmem:[#allocation8 + $0x54] sm:$0xf0]  ;;  %v2275_v28 = vor.u32 %v2782_v21, %v2274_v20 }
  0x47   :  { %v2346_v12 = vld [vmem:[#allocation8 + $0x1f0] sm:$0xf]  ;;  %v2283_v16 = vor.u32 %v2784_v9, %v2282_v8  ;;  %v2147_v17 = vor.u32 %v2750_v11, %v2146_v7  ;;  %v2338_v24 = vld [vmem:[#allocation8 + $0x1e0] sm:$0xf]  ;;  %v2780_v33 = vld [vmem:[#allocation8 + $0x154] sm:$0xf0] }
  0x48   :  { %572 = vmatpush.bf16.msrb.mxu0 %v1987_v13  ;;  %586 = vmatpush.bf16.msrb.mxu1 %v1991_v14  ;;  %v2800_v13 = vld [vmem:[#allocation8 + $0x1f4] sm:$0xf0]  ;;  %v2210_v14 = vld [vmem:[#allocation8 + $0xe0] sm:$0xf]  ;;  %v2266_v32 = vld [vmem:[#allocation8 + $0x150] sm:$0xf] }
  0x49   :  { %600 = vmatpush.bf16.msrb.mxu2 %v1995_v15  ;;  %v2766_v15 = vld [vmem:[#allocation8 + $0xe4] sm:$0xf0]  ;;  %v2347_v18 = vor.u32 %v2800_v13, %v2346_v12  ;;  %v2330_v36 = vld [vmem:[#allocation8 + $0x1d0] sm:$0xf]  ;;  %v2267_v40 = vor.u32 %v2780_v33, %v2266_v32  ;;  %v2744_v47 = vld [vmem:[#allocation8 + $0x34] sm:$0xf0] }
  0x4a   :  { %614 = vmatpush.bf16.msrb.mxu3 %v1999_v19  ;;  %v2138_v19 = vld [vmem:[#allocation8 + $0x50] sm:$0xf]  ;;  %v2211_v22 = vor.u32 %v2766_v15, %v2210_v14  ;;  %v2746_v35 = vld [vmem:[#allocation8 + $0x44] sm:$0xf0]  ;;  %v2322_v48 = vld [vmem:[#allocation8 + $0x1c0] sm:$0xf] }
  0x4b   :  { %v2139_v29 = vor.u32 %v2748_v23, %v2138_v19  ;;  %v2122_v42 = vld [vmem:[#allocation8 + $0x30] sm:$0xf]  ;;  %v2778_v45 = vld [vmem:[#allocation8 + $0x144] sm:$0xf0]  ;;  %v2760_v51 = vld [vmem:[#allocation8 + $0xb4] sm:$0xf0] }
  0x4c   :  { %573 = vmatpush.bf16.msrb.mxu0 %v1955_v25  ;;  %587 = vmatpush.bf16.msrb.mxu1 %v1959_v26  ;;  %v2798_v25 = vld [vmem:[#allocation8 + $0x1e4] sm:$0xf0]  ;;  %v2202_v26 = vld [vmem:[#allocation8 + $0xd0] sm:$0xf]  ;;  %v2114_v55 = vld [vmem:[#allocation8 + $0x20] sm:$0xf] }
  0x4d   :  { %601 = vmatpush.bf16.msrb.mxu2 %v1963_v27  ;;  %v2764_v27 = vld [vmem:[#allocation8 + $0xd4] sm:$0xf0]  ;;  %v2339_v30 = vor.u32 %v2798_v25, %v2338_v24  ;;  %v2794_v49 = vld [vmem:[#allocation8 + $0x1c4] sm:$0xf0]  ;;  %v2250_v56 = vld [vmem:[#allocation8 + $0x130] sm:$0xf] }
  0x4e   :  { %615 = vmatpush.bf16.msrb.mxu3 %v1967_v31  ;;  %v2130_v31 = vld [vmem:[#allocation8 + $0x40] sm:$0xf]  ;;  %v2203_v34 = vor.u32 %v2764_v27, %v2202_v26  ;;  %v2323_v54 = vor.u32 %v2794_v49, %v2322_v48  ;;  %v2742_v59 = vld [vmem:[#allocation8 + $0x24] sm:$0xf0]  ;;  %v2314_v60 = vld [vmem:[#allocation8 + $0x1b0] sm:$0xf] }
  0x4f   :  { %v2792_v61 = vld [vmem:[#allocation8 + $0x1b4] sm:$0xf0]  ;;  %v2178_v62 = vld [vmem:[#allocation8 + $0xa0] sm:$0xf]  ;;  %v2758_v63 = vld [vmem:[#allocation8 + $0xa4] sm:$0xf0]  ;;  %v2115_v1 = vor.u32 %v2742_v59, %v2114_v55 }
  0x50   :  { %574 = vmatpush.bf16.msrb.mxu0 %v1923_v37  ;;  %588 = vmatpush.bf16.msrb.mxu1 %v1927_v38  ;;  %v2796_v37 = vld [vmem:[#allocation8 + $0x1d4] sm:$0xf0]  ;;  %v2194_v38 = vld [vmem:[#allocation8 + $0xc0] sm:$0xf]  ;;  %v2315_v2 = vor.u32 %v2792_v61, %v2314_v60  ;;  %v2790_v9 = vld [vmem:[#allocation8 + $0x1a4] sm:$0xf0] }
  0x51   :  { %602 = vmatpush.bf16.msrb.mxu2 %v1931_v39  ;;  %v2762_v39 = vld [vmem:[#allocation8 + $0xc4] sm:$0xf0]  ;;  %v2331_v43 = vor.u32 %v2796_v37, %v2330_v36  ;;  %v2740_v7 = vld [vmem:[#allocation8 + $0x14] sm:$0xf0]  ;;  %v2306_v8 = vld [vmem:[#allocation8 + $0x1a0] sm:$0xf] }
  0x52   :  { %616 = vmatpush.bf16.msrb.mxu3 %v1935_v44  ;;  %v2258_v44 = vld [vmem:[#allocation8 + $0x140] sm:$0xf]  ;;  %v2195_v46 = vor.u32 %v2762_v39, %v2194_v38  ;;  %v2756_v11 = vld [vmem:[#allocation8 + $0x94] sm:$0xf0]  ;;  %v2307_v15 = vor.u32 %v2790_v9, %v2306_v8  ;;  %v2298_v21 = vld [vmem:[#allocation8 + $0x190] sm:$0xf] }
  0x53   :  { %v2098_v13 = vld [vmem:[#allocation8] sm:$0xf]  ;;  %v2754_v23 = vld [vmem:[#allocation8 + $0x84] sm:$0xf0]  ;;  %v2410_v24 = vld [vmem:[#allocation8 + $0x270] sm:$0xf] }
  0x54   :  { %575 = vmatpush.bf16.msrb.mxu0 %v1891_v50  ;;  %589 = vmatpush.bf16.msrb.mxu1 %v1895_v52  ;;  %v2186_v50 = vld [vmem:[#allocation8 + $0xb0] sm:$0xf]  ;;  %v2259_v52 = vor.u32 %v2778_v45, %v2258_v44  ;;  %v2162_v20 = vld [vmem:[#allocation8 + $0x80] sm:$0xf]  ;;  %v2816_v25 = vld [vmem:[#allocation8 + $0x274] sm:$0xf0] }
  0x55   :  { %603 = vmatpush.bf16.msrb.mxu2 %v1899_v53  ;;  %v2123_v53 = vor.u32 %v2744_v47, %v2122_v42  ;;  %v2187_v58 = vor.u32 %v2760_v51, %v2186_v50  ;;  %v2474_v26 = vld [vmem:[#allocation8 + $0x2f0] sm:$0xf]  ;;  %v2832_v27 = vld [vmem:[#allocation8 + $0x2f4] sm:$0xf0]  ;;  %v2226_v32 = vld [vmem:[#allocation8 + $0x100] sm:$0xf]  ;;  %v2411_v36 = vor.u32 %v2816_v25, %v2410_v24 }
  0x56   :  { %617 = vmatpush.bf16.msrb.mxu3 %v1903_v57  ;;  %v2776_v57 = vld [vmem:[#allocation8 + $0x134] sm:$0xf0]  ;;  %v2770_v33 = vld [vmem:[#allocation8 + $0x104] sm:$0xf0]  ;;  %v2538_v38 = vld [vmem:[#allocation8 + $0x370] sm:$0xf] }
  0x57   :  { %v2786_v37 = vld [vmem:[#allocation8 + $0x184] sm:$0xf0]  ;;  %v2848_v39 = vld [vmem:[#allocation8 + $0x374] sm:$0xf0]  ;;  %v2466_v44 = vld [vmem:[#allocation8 + $0x2e0] sm:$0xf] }
  0x58   :  { %576 = vmatpush.bf16.msrb.mxu0 %v1859_v0  ;;  %590 = vmatpush.bf16.msrb.mxu1 %v1863_v3  ;;  %v2251_v0 = vor.u32 %v2776_v57, %v2250_v56  ;;  %v2106_v3 = vld [vmem:[#allocation8 + $0x10] sm:$0xf]  ;;  %v2814_v42 = vld [vmem:[#allocation8 + $0x264] sm:$0xf0]  ;;  %v2539_v48 = vor.u32 %v2848_v39, %v2538_v38  ;;  %v2812_v55 = vld [vmem:[#allocation8 + $0x254] sm:$0xf0] }
  0x59   :  { %604 = vmatpush.bf16.msrb.mxu2 %v1867_v4  ;;  %v2242_v4 = vld [vmem:[#allocation8 + $0x120] sm:$0xf]  ;;  %v2107_v14 = vor.u32 %v2740_v7, %v2106_v3  ;;  %v2830_v45 = vld [vmem:[#allocation8 + $0x2e4] sm:$0xf0]  ;;  %v2394_v51 = vld [vmem:[#allocation8 + $0x250] sm:$0xf] }
  0x5a   :  { %618 = vmatpush.bf16.msrb.mxu3 %v1871_v5  ;;  %v2774_v5 = vld [vmem:[#allocation8 + $0x124] sm:$0xf0]  ;;  %v2594_v56 = vld [vmem:[#allocation8 + $0x3e0] sm:$0xf]  ;;  %v2828_v59 = vld [vmem:[#allocation8 + $0x2d4] sm:$0xf0]  ;;  %v2395_v61 = vor.u32 %v2812_v55, %v2394_v51 }
  0x5b   :  { %577 = vmatmul.bf16.vlgmr.msrb.gmra.mxu0 %v3116_v41  ;;  %591 = vmatmul.bf16.vlgmr.msrb.gmra.mxu1 %v3116_v41  ;;  %v2243_v12 = vor.u32 %v2774_v5, %v2242_v4  ;;  %v2862_v57 = vld [vmem:[#allocation8 + $0x3e4] sm:$0xf0]  ;;  %v2844_v7 = vld [vmem:[#allocation8 + $0x354] sm:$0xf0]  ;;  %v2586_v8 = vld [vmem:[#allocation8 + $0x3d0] sm:$0xf] }
  0x5c   :  { %1423 = vmatpush.bf16.msra.mxu0 %v2155_v6  ;;  %1437 = vmatpush.bf16.msra.mxu1 %v2219_v10  ;;  %v2179_v6 = vor.u32 %v2758_v63, %v2178_v62  ;;  %v2170_v10 = vld [vmem:[#allocation8 + $0x90] sm:$0xf]  ;;  %v2595_v62 = vor.u32 %v2862_v57, %v2594_v56  ;;  %v2826_v3 = vld [vmem:[#allocation8 + $0x2c4] sm:$0xf0]  ;;  %v2370_v24 = vld [vmem:[#allocation8 + $0x220] sm:$0xf] }
  0x5d   :  { %605 = vmatmul.bf16.vlgmr.msrb.gmra.mxu2 %v3116_v41  ;;  %619 = vmatmul.bf16.vlgmr.msrb.gmra.mxu3 %v3116_v41  ;;  %v2131_v41 = vor.u32 %v2746_v35, %v2130_v31  ;;  %v2171_v19 = vor.u32 %v2756_v11, %v2170_v10  ;;  %v2402_v31 = vld [vmem:[#allocation8 + $0x260] sm:$0xf]  ;;  %v2163_v35 = vor.u32 %v2754_v23, %v2162_v20  ;;  %v2860_v10 = vld [vmem:[#allocation8 + $0x3d4] sm:$0xf0]  ;;  %v2806_v25 = vld [vmem:[#allocation8 + $0x224] sm:$0xf0] }
  0x5e   :  { %1451 = vmatpush.bf16.msra.mxu2 %v2283_v16  ;;  %1465 = vmatpush.bf16.msra.mxu3 %v2347_v18  ;;  %v2738_v16 = vld [vmem:[#allocation8 + $0x4] sm:$0xf0]  ;;  %v2772_v18 = vld [vmem:[#allocation8 + $0x114] sm:$0xf0]  ;;  %v2403_v49 = vor.u32 %v2814_v42, %v2402_v31  ;;  %v2587_v11 = vor.u32 %v2860_v10, %v2586_v8  ;;  %v2578_v20 = vld [vmem:[#allocation8 + $0x3c0] sm:$0xf] }
  0x5f   :  { %v2840_v31 = vld [vmem:[#allocation8 + $0x334] sm:$0xf0]  ;;  %v2426_v39 = vld [vmem:[#allocation8 + $0x290] sm:$0xf]  ;;  %s1819_s8 = sshll.u32 %s3057_s30, 4  ;;  %s1821_s11 = sshll.u32 %s3191_s7, 4  ;;  %s1820_s8 = int_to_ptr.vmem [resolvable:$true] %s1819_s8  ;;  %s1822_s11 = int_to_ptr.hbm [resolvable:$true] %s1821_s11 }
  0x60   :  { %1424 = vmatpush.bf16.msra.mxu0 %v2147_v17  ;;  %1438 = vmatpush.bf16.msra.mxu1 %v2211_v22  ;;  %v2234_v17 = vld [vmem:[#allocation8 + $0x110] sm:$0xf]  ;;  %v2788_v22 = vld [vmem:[#allocation8 + $0x194] sm:$0xf0] }
  0x61   :  { %v2836_v55 = vld [vmem:[#allocation8 + $0x314] sm:$0xf0]  ;;  %v2554_v56 = vld [vmem:[#allocation8 + $0x390] sm:$0xf] }
  0x62   :  { %1452 = vmatpush.bf16.msra.mxu2 %v2275_v28  ;;  %1466 = vmatpush.bf16.msra.mxu3 %v2339_v30  ;;  %v2235_v28 = vor.u32 %v2772_v18, %v2234_v17  ;;  %v2299_v30 = vor.u32 %v2788_v22, %v2298_v21  ;;  %v2514_v18 = vld [vmem:[#allocation8 + $0x340] sm:$0xf]  ;;  %v2858_v22 = vld [vmem:[#allocation8 + $0x3c4] sm:$0xf0]  ;;  %v2852_v57 = vld [vmem:[#allocation8 + $0x394] sm:$0xf0] }
  0x63   :  { %v2579_v23 = vor.u32 %v2858_v22, %v2578_v20  ;;  %v2767_v20 = vld [vmem:[#allocation8 + $0xf4] sm:$0xf] }
  0x64   :  { %1425 = vmatpush.bf16.msra.mxu0 %v2139_v29  ;;  %1439 = vmatpush.bf16.msra.mxu1 %v2203_v34  ;;  %v2099_v29 = vor.u32 %v2738_v16, %v2098_v13  ;;  %v2290_v34 = vld [vmem:[#allocation8 + $0x180] sm:$0xf]  ;;  %v2808_v13 = vld [vmem:[#allocation8 + $0x234] sm:$0xf0] }
  0x65   :  { %v2291_v47 = vor.u32 %v2786_v37, %v2290_v34  ;;  %v2824_v16 = vld [vmem:[#allocation8 + $0x2b4] sm:$0xf0] }
  0x66   :  { %1453 = vmatpush.bf16.msra.mxu2 %v2267_v40  ;;  %1467 = vmatpush.bf16.msra.mxu3 %v2331_v43  ;;  %v2475_v40 = vor.u32 %v2832_v27, %v2474_v26  ;;  %v2864_v43 = vld [vmem:[#allocation8 + $0x3f4] sm:$0xf0]  ;;  %v2434_v26 = vld [vmem:[#allocation8 + $0x2a0] sm:$0xf]  ;;  %v2371_v27 = vor.u32 %v2806_v25, %v2370_v24 }
  0x67   :  { %v2856_v34 = vld [vmem:[#allocation8 + $0x3b4] sm:$0xf0] }
  0x68   :  { %1426 = vmatpush.bf16.msra.mxu0 %v2131_v41  ;;  %1440 = vmatpush.bf16.msra.mxu1 %v2195_v46  ;;  %v2602_v41 = vld [vmem:[#allocation8 + $0x3f0] sm:$0xf]  ;;  %v2227_v46 = vor.u32 %v2770_v33, %v2226_v32  ;;  %v2804_v37 = vld [vmem:[#allocation8 + $0x214] sm:$0xf0] }
  0x69   :  { %v2603_v50 = vor.u32 %v2864_v43, %v2602_v41  ;;  %v2570_v32 = vld [vmem:[#allocation8 + $0x3b0] sm:$0xf]  ;;  %v2498_v41 = vld [vmem:[#allocation8 + $0x320] sm:$0xf]  ;;  %v2838_v43 = vld [vmem:[#allocation8 + $0x324] sm:$0xf0] }
  0x6a   :  { %1454 = vmatpush.bf16.msra.mxu2 %v2259_v52  ;;  %1468 = vmatpush.bf16.msra.mxu3 %v2323_v54  ;;  %v2530_v52 = vld [vmem:[#allocation8 + $0x360] sm:$0xf]  ;;  %v2467_v54 = vor.u32 %v2830_v45, %v2466_v44  ;;  %v2499_v45 = vor.u32 %v2838_v43, %v2498_v41 }
  0x6b   :  { %v2562_v44 = vld [vmem:[#allocation8 + $0x3a0] sm:$0xf] }
  0x6c   :  { %1427 = vmatpush.bf16.msra.mxu0 %v2123_v53  ;;  %1441 = vmatpush.bf16.msra.mxu1 %v2187_v58  ;;  %v2846_v53 = vld [vmem:[#allocation8 + $0x364] sm:$0xf0]  ;;  %v2458_v58 = vld [vmem:[#allocation8 + $0x2d0] sm:$0xf] }
  0x6d   :  { %v2531_v60 = vor.u32 %v2846_v53, %v2530_v52  ;;  %v2459_v63 = vor.u32 %v2828_v59, %v2458_v58  ;;  %v2818_v52 = vld [vmem:[#allocation8 + $0x284] sm:$0xf0]  ;;  %v2555_v59 = vor.u32 %v2852_v57, %v2554_v56  ;;  %v2781_v57 = vld [vmem:[#allocation8 + $0x164] sm:$0xf] }
  0x6e   :  { %1455 = vmatpush.bf16.msra.mxu2 %v2251_v0  ;;  %1469 = vmatpush.bf16.msra.mxu3 %v2315_v2  ;;  %v2386_v0 = vld [vmem:[#allocation8 + $0x240] sm:$0xf] }
  0x6f   :  { %v2450_v2 = vld [vmem:[#allocation8 + $0x2c0] sm:$0xf] }
  0x70   :  { %1428 = vmatpush.bf16.msra.mxu0 %v2115_v1  ;;  %1442 = vmatpush.bf16.msra.mxu1 %v2179_v6  ;;  %v2810_v1 = vld [vmem:[#allocation8 + $0x244] sm:$0xf0]  ;;  %v2451_v5 = vor.u32 %v2826_v3, %v2450_v2  ;;  %v2522_v6 = vld [vmem:[#allocation8 + $0x350] sm:$0xf]  ;;  %v3126_v2 = vld [vmem:[#allocation7] sm:$0xff] }
  0x71   :  { %v2387_v4 = vor.u32 %v2810_v1, %v2386_v0  ;;  %v2523_v9 = vor.u32 %v2844_v7, %v2522_v6  ;;  %v2850_v0 = vld [vmem:[#allocation8 + $0x384] sm:$0xf0]  ;;  %v172_v6 = vperm.slane %v3126_v2, 1  ;;  %v174_v22 = vperm.slane %v3126_v2, 3 }
  0x72   :  { %1456 = vmatpush.bf16.msra.mxu2 %v2243_v12  ;;  %1470 = vmatpush.bf16.msra.mxu3 %v2307_v15  ;;  %v2378_v12 = vld [vmem:[#allocation8 + $0x230] sm:$0xf] }
  0x73   :  { %v2379_v15 = vor.u32 %v2808_v13, %v2378_v12 }
  0x74   :  { %1429 = vmatpush.bf16.msra.mxu0 %v2107_v14  ;;  %1443 = vmatpush.bf16.msra.mxu1 %v2171_v19  ;;  %v2442_v14 = vld [vmem:[#allocation8 + $0x2b0] sm:$0xf]  ;;  %v2842_v19 = vld [vmem:[#allocation8 + $0x344] sm:$0xf0] }
  0x75   :  { %v2443_v17 = vor.u32 %v2824_v16, %v2442_v14  ;;  %v2515_v21 = vor.u32 %v2842_v19, %v2514_v18  ;;  %v2156_v16 = vld [vmem:[#allocation8 + $0x78] sm:$0xf0]  ;;  %v173_v18 = vperm.slane %v3126_v2, 2 }
  0x76   :  { %1457 = vmatpush.bf16.msra.mxu2 %v2235_v28  ;;  %1471 = vmatpush.bf16.msra.mxu3 %v2299_v30  ;;  %v2822_v28 = vld [vmem:[#allocation8 + $0x2a4] sm:$0xf0]  ;;  %v2506_v30 = vld [vmem:[#allocation8 + $0x330] sm:$0xf] }
  0x77   :  { %v2507_v33 = vor.u32 %v2840_v31, %v2506_v30 }
  0x78   :  { %1430 = vmatpush.bf16.msra.mxu0 %v2099_v29  ;;  %1444 = vmatpush.bf16.msra.mxu1 %v2163_v35  ;;  %v2435_v29 = vor.u32 %v2822_v28, %v2434_v26  ;;  %v2571_v35 = vor.u32 %v2856_v34, %v2570_v32  ;;  %v2749_v28 = vld [vmem:[#allocation8 + $0x64] sm:$0xf] }
  0x79   :  { %v2765_v32 = vld [vmem:[#allocation8 + $0xe4] sm:$0xf] }
  0x7a   :  { %1458 = vmatpush.bf16.msra.mxu2 %v2227_v46  ;;  %1472 = vmatpush.bf16.msra.mxu3 %v2291_v47  ;;  %v2854_v46 = vld [vmem:[#allocation8 + $0x3a4] sm:$0xf0] }
  0x7b   :  { %v2563_v47 = vor.u32 %v2854_v46, %v2562_v44  ;;  %v2348_v44 = vld [vmem:[#allocation8 + $0x1f8] sm:$0xf0] }
  0x7c   :  { %1479 = vmatpush.bf16.msrb.mxu0 %v2411_v36  ;;  %1493 = vmatpush.bf16.msrb.mxu1 %v2475_v40  ;;  %v2362_v36 = vld [vmem:[#allocation8 + $0x210] sm:$0xf]  ;;  %v2820_v40 = vld [vmem:[#allocation8 + $0x294] sm:$0xf0]  ;;  %v2140_v46 = vld [vmem:[#allocation8 + $0x58] sm:$0xf0] }
  0x7d   :  { %v2363_v38 = vor.u32 %v2804_v37, %v2362_v36  ;;  %v2427_v42 = vor.u32 %v2820_v40, %v2426_v39  ;;  %v2783_v39 = vld [vmem:[#allocation8 + $0x174] sm:$0xf]  ;;  %v2284_v40 = vld [vmem:[#allocation8 + $0x178] sm:$0xf0] }
  0x7e   :  { %1507 = vmatpush.bf16.msrb.mxu2 %v2539_v48  ;;  %1521 = vmatpush.bf16.msrb.mxu3 %v2603_v50  ;;  %v2354_v48 = vld [vmem:[#allocation8 + $0x200] sm:$0xf] }
  0x7f   :  { %v2418_v50 = vld [vmem:[#allocation8 + $0x280] sm:$0xf] }
  0x80   :  { %1480 = vmatpush.bf16.msrb.mxu0 %v2403_v49  ;;  %1494 = vmatpush.bf16.msrb.mxu1 %v2467_v54  ;;  %v2802_v49 = vld [vmem:[#allocation8 + $0x204] sm:$0xf0]  ;;  %v2419_v53 = vor.u32 %v2818_v52, %v2418_v50  ;;  %v2490_v54 = vld [vmem:[#allocation8 + $0x310] sm:$0xf]  ;;  %v2204_v50 = vld [vmem:[#allocation8 + $0xd8] sm:$0xf0] }
  0x81   :  { %v2355_v51 = vor.u32 %v2802_v49, %v2354_v48  ;;  %v2491_v58 = vor.u32 %v2836_v55, %v2490_v54  ;;  %v2763_v49 = vld [vmem:[#allocation8 + $0xd4] sm:$0xf] }
  0x82   :  { %1508 = vmatpush.bf16.msrb.mxu2 %v2531_v60  ;;  %1522 = vmatpush.bf16.msrb.mxu3 %v2595_v62  ;;  %v2482_v60 = vld [vmem:[#allocation8 + $0x300] sm:$0xf] }
  0x84   :  { %1481 = vmatpush.bf16.msrb.mxu0 %v2395_v61  ;;  %1495 = vmatpush.bf16.msrb.mxu1 %v2459_v63  ;;  %v2834_v61 = vld [vmem:[#allocation8 + $0x304] sm:$0xf0]  ;;  %v2546_v63 = vld [vmem:[#allocation8 + $0x380] sm:$0xf] }
  0x85   :  { %v2483_v62 = vor.u32 %v2834_v61, %v2482_v60  ;;  %v2547_v1 = vor.u32 %v2850_v0, %v2546_v63  ;;  %v2207_v61 = vor.u32 %v2763_v49, %v2204_v50  ;;  %v2745_v63 = vld [vmem:[#allocation8 + $0x44] sm:$0xf]  ;;  %v2132_v0 = vld [vmem:[#allocation8 + $0x48] sm:$0xf0] }
  0x86   :  { %1509 = vmatpush.bf16.msrb.mxu2 %v2523_v9  ;;  %1523 = vmatpush.bf16.msrb.mxu3 %v2587_v11  ;;  %v2773_v49 = vld [vmem:[#allocation8 + $0x124] sm:$0xf]  ;;  %v2244_v50 = vld [vmem:[#allocation8 + $0x128] sm:$0xf0] }
  0x88   :  { %1482 = vmatpush.bf16.msrb.mxu0 %v2387_v4  ;;  %1496 = vmatpush.bf16.msrb.mxu1 %v2451_v5  ;;  %v171_v4 = vperm.slane %v3126_v2, 0 }
  0x8a   :  { %1510 = vmatpush.bf16.msrb.mxu2 %v2515_v21  ;;  %1524 = vmatpush.bf16.msrb.mxu3 %v2579_v23  ;;  %v2220_v21 = vld [vmem:[#allocation8 + $0xf8] sm:$0xf0] }
  0x8c   :  { %1483 = vmatpush.bf16.msrb.mxu0 %v2379_v15  ;;  %1497 = vmatpush.bf16.msrb.mxu1 %v2443_v17  ;;  %v2751_v15 = vld [vmem:[#allocation8 + $0x74] sm:$0xf] }
  0x8d   :  { %v2159_v25 = vor.u32 %v2751_v15, %v2156_v16  ;;  %v2188_v15 = vld [vmem:[#allocation8 + $0xb8] sm:$0xf0] }
  0x8e   :  { %1511 = vmatpush.bf16.msrb.mxu2 %v2507_v33  ;;  %1525 = vmatpush.bf16.msrb.mxu3 %v2571_v35  ;;  %v2212_v33 = vld [vmem:[#allocation8 + $0xe8] sm:$0xf0] }
  0x8f   :  { %v2215_v43 = vor.u32 %v2765_v32, %v2212_v33  ;;  %v2180_v32 = vld [vmem:[#allocation8 + $0xa8] sm:$0xf0]  ;;  %v176_v33 = vperm.slane %v3126_v2, 5 }
  0x90   :  { %1484 = vmatpush.bf16.msrb.mxu0 %v2371_v27  ;;  %1498 = vmatpush.bf16.msrb.mxu1 %v2435_v29  ;;  %v2223_v27 = vor.u32 %v2767_v20, %v2220_v21  ;;  %v2148_v29 = vld [vmem:[#allocation8 + $0x68] sm:$0xf0]  ;;  %v2793_v21 = vld [vmem:[#allocation8 + $0x1c4] sm:$0xf] }
  0x91   :  { %v2260_v20 = vld [vmem:[#allocation8 + $0x148] sm:$0xf0] }
  0x92   :  { %1512 = vmatpush.bf16.msrb.mxu2 %v2499_v45  ;;  %1526 = vmatpush.bf16.msrb.mxu3 %v2563_v47  ;;  %v2747_v45 = vld [vmem:[#allocation8 + $0x54] sm:$0xf] }
  0x93   :  { %v2143_v56 = vor.u32 %v2747_v45, %v2140_v46  ;;  %v2755_v45 = vld [vmem:[#allocation8 + $0x94] sm:$0xf]  ;;  %v2172_v46 = vld [vmem:[#allocation8 + $0x98] sm:$0xf0] }
  0x94   :  { %1485 = vmatpush.bf16.msrb.mxu0 %v2363_v38  ;;  %1499 = vmatpush.bf16.msrb.mxu1 %v2427_v42  ;;  %v2151_v38 = vor.u32 %v2749_v28, %v2148_v29  ;;  %v2799_v42 = vld [vmem:[#allocation8 + $0x1f4] sm:$0xf]  ;;  %v175_v28 = vperm.slane %v3126_v2, 4 }
  0x95   :  { %v2351_v55 = vor.u32 %v2799_v42, %v2348_v44  ;;  %v2316_v42 = vld [vmem:[#allocation8 + $0x1b8] sm:$0xf0] }
  0x96   :  { %1513 = vmatpush.bf16.msrb.mxu2 %v2491_v58  ;;  %1527 = vmatpush.bf16.msrb.mxu3 %v2555_v59  ;;  %v2276_v58 = vld [vmem:[#allocation8 + $0x168] sm:$0xf0]  ;;  %v2797_v59 = vld [vmem:[#allocation8 + $0x1e4] sm:$0xf] }
  0x98   :  { %1486 = vmatpush.bf16.msrb.mxu0 %v2355_v51  ;;  %1500 = vmatpush.bf16.msrb.mxu1 %v2419_v53  ;;  %v2287_v53 = vor.u32 %v2783_v39, %v2284_v40  ;;  %v2791_v39 = vld [vmem:[#allocation8 + $0x1b4] sm:$0xf] }
  0x9a   :  { %1514 = vmatpush.bf16.msrb.mxu2 %v2483_v62  ;;  %1528 = vmatpush.bf16.msrb.mxu3 %v2547_v1  ;;  %v2340_v62 = vld [vmem:[#allocation8 + $0x1e8] sm:$0xf0]  ;;  %v2761_v1 = vld [vmem:[#allocation8 + $0xc4] sm:$0xf] }
  0xb8   :  { %v522_v3 = vpop.f32.mrf.mxu0  ;;  %v536_v5 = vpop.f32.mrf.mxu1 }
  0xb9   :  { %v523_v7 = vadd.f32 %v522_v3, %v171_v4  ;;  %v537_v8 = vadd.f32 %v536_v5, %v172_v6  ;;  %v2196_v3 = vld [vmem:[#allocation8 + $0xc8] sm:$0xf0]  ;;  %v2343_v5 = vor.u32 %v2797_v59, %v2340_v62 }
  0xba   :  { %v2100_v62 = vld [vmem:[#allocation8 + $0x8] sm:$0xf0] }
  0xbb   :  { %v625_v12 = vmax.f32 %v523_v7, 0.0  ;;  %v626_v17 = vmax.f32 %v537_v8, 0.0  ;;  %v2779_v7 = vld [vmem:[#allocation8 + $0x154] sm:$0xf]  ;;  %v2268_v8 = vld [vmem:[#allocation8 + $0x158] sm:$0xf0] }
  0xbc   :  { %v2271_v16 = vor.u32 %v2779_v7, %v2268_v8  ;;  %v177_v8 = vperm.slane %v3126_v2, 6 }
  0xc0   :  { %v564_v10 = vpop.f32.mrf.mxu3  ;;  %v524_v11 = vpop.f32.mrf.mxu0 }
  0xc1   :  { %v550_v9 = vpop.f32.mrf.mxu2  ;;  %v525_v13 = vadd.f32 %v524_v11, %v171_v4  ;;  %v538_v14 = vpop.f32.mrf.mxu1  ;;  %v565_v34 = vadd.f32 %v564_v10, %v174_v22  ;;  %v2279_v4 = vor.u32 %v2781_v57, %v2276_v58  ;;  %v2199_v10 = vor.u32 %v2761_v1, %v2196_v3  ;;  %v2332_v11 = vld [vmem:[#allocation8 + $0x1d8] sm:$0xf0]  ;;  %v2737_v57 = vld [vmem:[#allocation8 + $0x4] sm:$0xf] }
  0xc2   :  { %v539_v19 = vadd.f32 %v538_v14, %v172_v6  ;;  %v551_v30 = vadd.f32 %v550_v9, %v173_v18  ;;  %v2135_v6 = vor.u32 %v2745_v63, %v2132_v0  ;;  %v2795_v9 = vld [vmem:[#allocation8 + $0x1d4] sm:$0xf]  ;;  %v2753_v63 = vld [vmem:[#allocation8 + $0x84] sm:$0xf]  ;;  %v2164_v0 = vld [vmem:[#allocation8 + $0x88] sm:$0xf0] }
  0xc3   :  { %v633_v23 = vmax.f32 %v525_v13, 0.0  ;;  %v628_v51 = vmax.f32 %v565_v34, 0.0  ;;  %v2124_v13 = vld [vmem:[#allocation8 + $0x38] sm:$0xf0]  ;;  %v2759_v14 = vld [vmem:[#allocation8 + $0xb4] sm:$0xf] }
  0xc4   :  { %v634_v24 = vmax.f32 %v539_v19, 0.0  ;;  %v627_v47 = vmax.f32 %v551_v30, 0.0  ;;  %v2777_v19 = vld [vmem:[#allocation8 + $0x144] sm:$0xf] }
  0xc5   :  { %v3132_v26 = vpack.c.bf16 %v633_v23, %v625_v12  ;;  %v2743_v12 = vld [vmem:[#allocation8 + $0x34] sm:$0xf]  ;;  %v2191_v23 = vor.u32 %v2759_v14, %v2188_v15  ;;  %v2757_v30 = vld [vmem:[#allocation8 + $0xa4] sm:$0xf]  ;;  %v2263_v34 = vor.u32 %v2777_v19, %v2260_v20  ;;  %v2103_v19 = vor.u32 %v2737_v57, %v2100_v62 }
  0xc6   :  { %v3134_v31 = vpack.c.bf16 %v634_v24, %v626_v17  ;;  %v2335_v17 = vor.u32 %v2795_v9, %v2332_v11  ;;  %v2324_v24 = vld [vmem:[#allocation8 + $0x1c8] sm:$0xf0]  ;;  %v2183_v40 = vor.u32 %v2757_v30, %v2180_v32  ;;  %v2831_v11 = vld [vmem:[#allocation8 + $0x2f4] sm:$0xf]  ;;  %v2829_v32 = vld [vmem:[#allocation8 + $0x2e4] sm:$0xf] }
  0xc7   :  { %1431 = vmatmul.bf16.vlgmr.msra.gmra.mxu0 %v3132_v26  ;;  %v2787_v20 = vld [vmem:[#allocation8 + $0x194] sm:$0xf]  ;;  %v2404_v30 = vld [vmem:[#allocation8 + $0x268] sm:$0xf0] }
  0xc8   :  { %v566_v37 = vpop.f32.mrf.mxu3  ;;  %1445 = vmatmul.bf16.vlgmr.msra.gmra.mxu1 %v3134_v31  ;;  %1535 = vmatpush.bf16.msra.mxu0 %v2159_v25  ;;  %v2741_v25 = vld [vmem:[#allocation8 + $0x24] sm:$0xf] }
  0xc9   :  { %v552_v35 = vpop.f32.mrf.mxu2  ;;  %v567_v41 = vadd.f32 %v566_v37, %v174_v22  ;;  %1549 = vmatpush.bf16.msra.mxu1 %v2223_v27  ;;  %v2116_v27 = vld [vmem:[#allocation8 + $0x28] sm:$0xf0]  ;;  %v2775_v37 = vld [vmem:[#allocation8 + $0x134] sm:$0xf] }
  0xca   :  { %v553_v36 = vadd.f32 %v552_v35, %v173_v18  ;;  %v2127_v18 = vor.u32 %v2743_v12, %v2124_v13  ;;  %v2327_v35 = vor.u32 %v2793_v21, %v2324_v24  ;;  %v2476_v12 = vld [vmem:[#allocation8 + $0x2f8] sm:$0xf0]  ;;  %v178_v13 = vperm.slane %v3126_v2, 7 }
  0xcb   :  { %v636_v52 = vmax.f32 %v567_v41, 0.0  ;;  %v2739_v41 = vld [vmem:[#allocation8 + $0x14] sm:$0xf]  ;;  %v2300_v21 = vld [vmem:[#allocation8 + $0x198] sm:$0xf0]  ;;  %v2479_v2 = vor.u32 %v2831_v11, %v2476_v12 }
  0xcc   :  { %v635_v48 = vmax.f32 %v553_v36, 0.0  ;;  %1536 = vmatpush.bf16.msra.mxu0 %v2151_v38  ;;  %v2119_v36 = vor.u32 %v2741_v25, %v2116_v27  ;;  %v2252_v38 = vld [vmem:[#allocation8 + $0x138] sm:$0xf0]  ;;  %v2825_v11 = vld [vmem:[#allocation8 + $0x2c4] sm:$0xf] }
  0xcd   :  { %v3140_v60 = vpack.c.bf16 %v636_v52, %v628_v51  ;;  %1550 = vmatpush.bf16.msra.mxu1 %v2215_v43  ;;  %v2108_v43 = vld [vmem:[#allocation8 + $0x18] sm:$0xf0]  ;;  %v2319_v52 = vor.u32 %v2791_v39, %v2316_v42  ;;  %v2785_v42 = vld [vmem:[#allocation8 + $0x184] sm:$0xf]  ;;  %v2452_v12 = vld [vmem:[#allocation8 + $0x2c8] sm:$0xf0] }
  0xce   :  { %v3138_v54 = vpack.c.bf16 %v635_v48, %v627_v47  ;;  %v2255_v48 = vor.u32 %v2775_v37, %v2252_v38  ;;  %v2769_v37 = vld [vmem:[#allocation8 + $0x104] sm:$0xf]  ;;  %v2228_v38 = vld [vmem:[#allocation8 + $0x108] sm:$0xf0] }
  0xcf   :  { %1473 = vmatmul.bf16.vlgmr.msra.gmra.mxu3 %v3140_v60  ;;  %v2231_v57 = vor.u32 %v2769_v37, %v2228_v38  ;;  %v2372_v37 = vld [vmem:[#allocation8 + $0x228] sm:$0xf0]  ;;  %v2821_v38 = vld [vmem:[#allocation8 + $0x2a4] sm:$0xf] }
  0xd0   :  { %1459 = vmatmul.bf16.vlgmr.msra.gmra.mxu2 %v3138_v54  ;;  %1577 = vmatpush.bf16.msra.mxu3 %v2351_v55  ;;  %v2789_v55 = vld [vmem:[#allocation8 + $0x1a4] sm:$0xf] }
  0xd1   :  { %1563 = vmatpush.bf16.msra.mxu2 %v2287_v53  ;;  %1537 = vmatpush.bf16.msra.mxu0 %v2143_v56  ;;  %v2111_v53 = vor.u32 %v2739_v41, %v2108_v43  ;;  %v2308_v56 = vld [vmem:[#allocation8 + $0x1a8] sm:$0xf0]  ;;  %v2847_v43 = vld [vmem:[#allocation8 + $0x374] sm:$0xf] }
  0xd2   :  { %1551 = vmatpush.bf16.msra.mxu1 %v2207_v61  ;;  %v2175_v61 = vor.u32 %v2755_v45, %v2172_v46  ;;  %v2311_v15 = vor.u32 %v2789_v55, %v2308_v56  ;;  %v2292_v41 = vld [vmem:[#allocation8 + $0x188] sm:$0xf0]  ;;  %v2540_v46 = vld [vmem:[#allocation8 + $0x378] sm:$0xf0] }
  0xd3   :  { %v2295_v62 = vor.u32 %v2785_v42, %v2292_v41 }
  0xd4   :  { %1578 = vmatpush.bf16.msra.mxu3 %v2343_v5  ;;  %v2815_v5 = vld [vmem:[#allocation8 + $0x274] sm:$0xf] }
  0xd5   :  { %1564 = vmatpush.bf16.msra.mxu2 %v2279_v4  ;;  %1538 = vmatpush.bf16.msra.mxu0 %v2135_v6  ;;  %v2412_v6 = vld [vmem:[#allocation8 + $0x278] sm:$0xf0] }
  0xd6   :  { %1552 = vmatpush.bf16.msra.mxu1 %v2199_v10  ;;  %v2247_v10 = vor.u32 %v2773_v49, %v2244_v50  ;;  %v2415_v24 = vor.u32 %v2815_v5, %v2412_v6  ;;  %v2532_v5 = vld [vmem:[#allocation8 + $0x368] sm:$0xf0]  ;;  %v2861_v6 = vld [vmem:[#allocation8 + $0x3e4] sm:$0xf] }
  0xd8   :  { %v578_v22 = vpop.f32.mrf.mxu0  ;;  %v592_v29 = vpop.f32.mrf.mxu1  ;;  %1579 = vmatpush.bf16.msra.mxu3 %v2335_v17  ;;  %v2236_v17 = vld [vmem:[#allocation8 + $0x118] sm:$0xf0] }
  0xd9   :  { %1565 = vmatpush.bf16.msra.mxu2 %v2271_v16  ;;  %1539 = vmatpush.bf16.msra.mxu0 %v2127_v18  ;;  %v579_v44 = vadd.f32 %v578_v22, %v175_v28  ;;  %v593_v47 = vadd.f32 %v592_v29, %v176_v33  ;;  %v2771_v16 = vld [vmem:[#allocation8 + $0x114] sm:$0xf]  ;;  %v2813_v29 = vld [vmem:[#allocation8 + $0x264] sm:$0xf] }
  0xda   :  { %1553 = vmatpush.bf16.msra.mxu1 %v2191_v23  ;;  %v2167_v23 = vor.u32 %v2753_v63, %v2164_v0  ;;  %v2407_v45 = vor.u32 %v2813_v29, %v2404_v30  ;;  %v2543_v63 = vor.u32 %v2847_v43, %v2540_v46  ;;  %v2841_v30 = vld [vmem:[#allocation8 + $0x344] sm:$0xf]  ;;  %v2839_v43 = vld [vmem:[#allocation8 + $0x334] sm:$0xf] }
  0xdb   :  { %v629_v1 = vmax.f32 %v579_v44, 0.0  ;;  %v630_v7 = vmax.f32 %v593_v47, 0.0  ;;  %v2863_v47 = vld [vmem:[#allocation8 + $0x3f4] sm:$0xf] }
  0xdc   :  { %1580 = vmatpush.bf16.msra.mxu3 %v2327_v35  ;;  %v2303_v35 = vor.u32 %v2787_v20, %v2300_v21  ;;  %v2588_v20 = vld [vmem:[#allocation8 + $0x3d8] sm:$0xf0]  ;;  %v2807_v21 = vld [vmem:[#allocation8 + $0x234] sm:$0xf] }
  0xdd   :  { %1566 = vmatpush.bf16.msra.mxu2 %v2263_v34  ;;  %1540 = vmatpush.bf16.msra.mxu0 %v2119_v36  ;;  %v2468_v36 = vld [vmem:[#allocation8 + $0x2e8] sm:$0xf0] }
  0xde   :  { %1554 = vmatpush.bf16.msra.mxu1 %v2183_v40 }
  0xe0   :  { %v606_v51 = vpop.f32.mrf.mxu2  ;;  %v620_v58 = vpop.f32.mrf.mxu3  ;;  %1581 = vmatpush.bf16.msra.mxu3 %v2319_v52  ;;  %v2811_v52 = vld [vmem:[#allocation8 + $0x254] sm:$0xf] }
  0xe1   :  { %v580_v59 = vpop.f32.mrf.mxu0  ;;  %v594_v4 = vpop.f32.mrf.mxu1  ;;  %1567 = vmatpush.bf16.msra.mxu2 %v2255_v48  ;;  %1541 = vmatpush.bf16.msra.mxu0 %v2111_v53  ;;  %v607_v25 = vadd.f32 %v606_v51, %v177_v8  ;;  %v2604_v48 = vld [vmem:[#allocation8 + $0x3f8] sm:$0xf0]  ;;  %v2471_v51 = vor.u32 %v2829_v32, %v2468_v36  ;;  %v2516_v32 = vld [vmem:[#allocation8 + $0x348] sm:$0xf0]  ;;  %v2805_v36 = vld [vmem:[#allocation8 + $0x224] sm:$0xf] }
  0xe2   :  { %v581_v3 = vadd.f32 %v580_v59, %v175_v28  ;;  %v595_v9 = vadd.f32 %v594_v4, %v176_v33  ;;  %1555 = vmatpush.bf16.msra.mxu1 %v2175_v61  ;;  %v2239_v28 = vor.u32 %v2771_v16, %v2236_v17  ;;  %v621_v33 = vadd.f32 %v620_v58, %v178_v13  ;;  %v2396_v53 = vld [vmem:[#allocation8 + $0x258] sm:$0xf0]  ;;  %v2827_v58 = vld [vmem:[#allocation8 + $0x2d4] sm:$0xf]  ;;  %v2845_v4 = vld [vmem:[#allocation8 + $0x364] sm:$0xf] }
  0xe3   :  { %v631_v49 = vmax.f32 %v607_v25, 0.0  ;;  %v2460_v59 = vld [vmem:[#allocation8 + $0x2d8] sm:$0xf0]  ;;  %v2843_v16 = vld [vmem:[#allocation8 + $0x354] sm:$0xf]  ;;  %v2375_v41 = vor.u32 %v2805_v36, %v2372_v37 }
  0xe4   :  { %v637_v14 = vmax.f32 %v581_v3, 0.0  ;;  %v638_v18 = vmax.f32 %v595_v9, 0.0  ;;  %1582 = vmatpush.bf16.msra.mxu3 %v2311_v15  ;;  %v632_v55 = vmax.f32 %v621_v33, 0.0  ;;  %v2399_v3 = vor.u32 %v2811_v52, %v2396_v53  ;;  %v2809_v9 = vld [vmem:[#allocation8 + $0x244] sm:$0xf]  ;;  %v2879_v36 = vld [vmem:[#allocation10 + $0x70] sm:$0xff] }
  0xe5   :  { %1568 = vmatpush.bf16.msra.mxu2 %v2247_v10  ;;  %1542 = vmatpush.bf16.msra.mxu0 %v2103_v19  ;;  %v2388_v10 = vld [vmem:[#allocation8 + $0x248] sm:$0xf0]  ;;  %v2524_v17 = vld [vmem:[#allocation8 + $0x358] sm:$0xf0]  ;;  %v2455_v19 = vor.u32 %v2825_v11, %v2452_v12  ;;  %v2857_v33 = vld [vmem:[#allocation8 + $0x3c4] sm:$0xf] }
  0xe6   :  { %v3148_v22 = vpack.c.bf16 %v637_v14, %v629_v1  ;;  %v3150_v27 = vpack.c.bf16 %v638_v18, %v630_v7  ;;  %1556 = vmatpush.bf16.msra.mxu1 %v2167_v23  ;;  %v2607_v1 = vor.u32 %v2863_v47, %v2604_v48  ;;  %v2463_v7 = vor.u32 %v2827_v58, %v2460_v59  ;;  %v2859_v18 = vld [vmem:[#allocation8 + $0x3d4] sm:$0xf]  ;;  %v2380_v23 = vld [vmem:[#allocation8 + $0x238] sm:$0xf0]  ;;  %v2837_v53 = vld [vmem:[#allocation8 + $0x324] sm:$0xf] }
  0xe7   :  { %v2391_v15 = vor.u32 %v2809_v9, %v2388_v10  ;;  %v2444_v25 = vld [vmem:[#allocation8 + $0x2b8] sm:$0xf0]  ;;  %v2383_v29 = vor.u32 %v2807_v21, %v2380_v23  ;;  %v2803_v48 = vld [vmem:[#allocation8 + $0x214] sm:$0xf]  ;;  %v2564_v58 = vld [vmem:[#allocation8 + $0x3a8] sm:$0xf0] }
  0xe8   :  { %v608_v34 = vpop.f32.mrf.mxu2  ;;  %1487 = vmatmul.bf16.vlgmr.msrb.gmra.mxu0 %v3148_v22  ;;  %v622_v40 = vpop.f32.mrf.mxu3  ;;  %1501 = vmatmul.bf16.vlgmr.msrb.gmra.mxu1 %v3150_v27  ;;  %v2572_v47 = vld [vmem:[#allocation8 + $0x3b8] sm:$0xf0]  ;;  %v2801_v59 = vld [vmem:[#allocation8 + $0x204] sm:$0xf]  ;;  %v2851_v9 = vld [vmem:[#allocation8 + $0x394] sm:$0xf] }
  0xe9   :  { %v609_v39 = vadd.f32 %v608_v34, %v177_v8  ;;  %v623_v44 = vadd.f32 %v622_v40, %v178_v13  ;;  %1591 = vmatpush.bf16.msrb.mxu0 %v2415_v24  ;;  %1569 = vmatpush.bf16.msra.mxu2 %v2239_v28  ;;  %v2596_v8 = vld [vmem:[#allocation8 + $0x3e8] sm:$0xf0]  ;;  %v2535_v13 = vor.u32 %v2845_v4, %v2532_v5  ;;  %v2823_v24 = vld [vmem:[#allocation8 + $0x2b4] sm:$0xf]  ;;  %v2868_v21 = vld [vmem:[#allocation10 + $0x18] sm:$0xff] }
  0xea   :  { %1605 = vmatpush.bf16.msrb.mxu1 %v2479_v2  ;;  %1583 = vmatpush.bf16.msra.mxu3 %v2303_v35  ;;  %v2599_v14 = vor.u32 %v2861_v6, %v2596_v8  ;;  %v2527_v2 = vor.u32 %v2843_v16, %v2524_v17  ;;  %v2591_v28 = vor.u32 %v2859_v18, %v2588_v20  ;;  %v2580_v35 = vld [vmem:[#allocation8 + $0x3c8] sm:$0xf0]  ;;  %v2835_v6 = vld [vmem:[#allocation8 + $0x314] sm:$0xf]  ;;  %v2872_v17 = vld [vmem:[#allocation10 + $0x38] sm:$0xff] }
  0xeb   :  { %v639_v50 = vmax.f32 %v609_v39, 0.0  ;;  %v640_v56 = vmax.f32 %v623_v44, 0.0  ;;  %v2447_v34 = vor.u32 %v2823_v24, %v2444_v25  ;;  %v2436_v39 = vld [vmem:[#allocation8 + $0x2a8] sm:$0xf0]  ;;  %v2519_v40 = vor.u32 %v2841_v30, %v2516_v32  ;;  %v2508_v44 = vld [vmem:[#allocation8 + $0x338] sm:$0xf0] }
  0xec   :  { %v2583_v42 = vor.u32 %v2857_v33, %v2580_v35  ;;  %v2439_v46 = vor.u32 %v2821_v38, %v2436_v39  ;;  %v2484_v12 = vld [vmem:[#allocation8 + $0x308] sm:$0xf0]  ;;  %v2871_v18 = vld [vmem:[#allocation10 + $0x30] sm:$0xff]  ;;  %v2869_v20 = vld [vmem:[#allocation10 + $0x20] sm:$0xff] }
  0xed   :  { %v3154_v61 = vpack.c.bf16 %v639_v50, %v631_v49  ;;  %v3156_v0 = vpack.c.bf16 %v640_v56, %v632_v55  ;;  %1592 = vmatpush.bf16.msrb.mxu0 %v2407_v45  ;;  %1570 = vmatpush.bf16.msra.mxu2 %v2231_v57  ;;  %v2855_v45 = vld [vmem:[#allocation8 + $0x3b4] sm:$0xf]  ;;  %v2364_v49 = vld [vmem:[#allocation8 + $0x218] sm:$0xf0]  ;;  %v2500_v55 = vld [vmem:[#allocation8 + $0x328] sm:$0xf0] }
  0xee   :  { %1606 = vmatpush.bf16.msrb.mxu1 %v2471_v51  ;;  %1584 = vmatpush.bf16.msra.mxu3 %v2295_v62  ;;  %v2819_v50 = vld [vmem:[#allocation8 + $0x294] sm:$0xf]  ;;  %v2511_v51 = vor.u32 %v2839_v43, %v2508_v44  ;;  %v2367_v52 = vor.u32 %v2803_v48, %v2364_v49  ;;  %v2853_v56 = vld [vmem:[#allocation8 + $0x3a4] sm:$0xf]  ;;  %v2356_v62 = vld [vmem:[#allocation8 + $0x208] sm:$0xf0] }
  0xef   :  { %1515 = vmatmul.bf16.vlgmr.msrb.gmra.mxu2 %v3154_v61  ;;  %1529 = vmatmul.bf16.vlgmr.msrb.gmra.mxu3 %v3156_v0  ;;  %v2567_v4 = vor.u32 %v2853_v56, %v2564_v58  ;;  %v2359_v5 = vor.u32 %v2801_v59, %v2356_v62  ;;  %v2866_v24 = vld [vmem:[#allocation10 + $0x8] sm:$0xff]  ;;  %v2880_v32 = vld [vmem:[#allocation10 + $0x78] sm:$0xff] }
  0xf1   :  { %1619 = vmatpush.bf16.msrb.mxu2 %v2543_v63  ;;  %1593 = vmatpush.bf16.msrb.mxu0 %v2399_v3  ;;  %v2817_v63 = vld [vmem:[#allocation8 + $0x284] sm:$0xf]  ;;  %v2503_v3 = vor.u32 %v2837_v53, %v2500_v55 }
  0xf2   :  { %1633 = vmatpush.bf16.msrb.mxu3 %v2607_v1  ;;  %1607 = vmatpush.bf16.msrb.mxu1 %v2463_v7  ;;  %v2420_v1 = vld [vmem:[#allocation8 + $0x288] sm:$0xf0]  ;;  %v2492_v7 = vld [vmem:[#allocation8 + $0x318] sm:$0xf0] }
  0xf3   :  { %v2423_v8 = vor.u32 %v2817_v63, %v2420_v1  ;;  %v2495_v10 = vor.u32 %v2835_v6, %v2492_v7 }
  0xf5   :  { %1620 = vmatpush.bf16.msrb.mxu2 %v2535_v13  ;;  %1594 = vmatpush.bf16.msrb.mxu0 %v2391_v15  ;;  %v2849_v13 = vld [vmem:[#allocation8 + $0x384] sm:$0xf] }
  0xf6   :  { %1634 = vmatpush.bf16.msrb.mxu3 %v2599_v14  ;;  %1608 = vmatpush.bf16.msrb.mxu1 %v2455_v19  ;;  %v2548_v14 = vld [vmem:[#allocation8 + $0x388] sm:$0xf0] }
  0xf7   :  { %v2551_v16 = vor.u32 %v2849_v13, %v2548_v14  ;;  %v2870_v19 = vld [vmem:[#allocation10 + $0x28] sm:$0xff] }
  0xf8   :  { %1543 = vmatmul.bf16.vlgmr.msra.gmra.mxu0 %v3132_v26  ;;  %1557 = vmatmul.bf16.vlgmr.msra.gmra.mxu1 %v3134_v31  ;;  %v2428_v26 = vld [vmem:[#allocation8 + $0x298] sm:$0xf0]  ;;  %v2575_v31 = vor.u32 %v2855_v45, %v2572_v47  ;;  %v2877_v47 = vld [vmem:[#allocation10 + $0x60] sm:$0xff] }
  0xf9   :  { %1621 = vmatpush.bf16.msrb.mxu2 %v2527_v2  ;;  %1595 = vmatpush.bf16.msrb.mxu0 %v2383_v29  ;;  %v2431_v57 = vor.u32 %v2819_v50, %v2428_v26 }
  0xfa   :  { %1635 = vmatpush.bf16.msrb.mxu3 %v2591_v28  ;;  %1609 = vmatpush.bf16.msrb.mxu1 %v2447_v34  ;;  %v2865_v28 = vld [vmem:[#allocation10] sm:$0xff] }
  0xfd   :  { %1622 = vmatpush.bf16.msrb.mxu2 %v2519_v40  ;;  %1596 = vmatpush.bf16.msrb.mxu0 %v2375_v41  ;;  %v2878_v41 = vld [vmem:[#allocation10 + $0x68] sm:$0xff] }
  0xfe   :  { %1636 = vmatpush.bf16.msrb.mxu3 %v2583_v42  ;;  %1610 = vmatpush.bf16.msrb.mxu1 %v2439_v46 }
  0xff   :  { %1571 = vmatmul.bf16.vlgmr.msra.gmra.mxu2 %v3138_v54  ;;  %1585 = vmatmul.bf16.vlgmr.msra.gmra.mxu3 %v3140_v60  ;;  %v2556_v54 = vld [vmem:[#allocation8 + $0x398] sm:$0xf0]  ;;  %v2833_v60 = vld [vmem:[#allocation8 + $0x304] sm:$0xf] }
 0x100   :  { %v2559_v11 = vor.u32 %v2851_v9, %v2556_v54  ;;  %v2487_v15 = vor.u32 %v2833_v60, %v2484_v12  ;;  %v2873_v54 = vld [vmem:[#allocation10 + $0x40] sm:$0xff] }
 0x101   :  { %1623 = vmatpush.bf16.msrb.mxu2 %v2511_v51  ;;  %1597 = vmatpush.bf16.msrb.mxu0 %v2367_v52 }
 0x102   :  { %1637 = vmatpush.bf16.msrb.mxu3 %v2575_v31  ;;  %1611 = vmatpush.bf16.msrb.mxu1 %v2431_v57  ;;  %v2876_v31 = vld [vmem:[#allocation10 + $0x58] sm:$0xff]  ;;  %v2875_v57 = vld [vmem:[#allocation10 + $0x50] sm:$0xff] }
 0x105   :  { %1624 = vmatpush.bf16.msrb.mxu2 %v2503_v3  ;;  %1598 = vmatpush.bf16.msrb.mxu0 %v2359_v5 }
 0x106   :  { %1638 = vmatpush.bf16.msrb.mxu3 %v2567_v4  ;;  %1612 = vmatpush.bf16.msrb.mxu1 %v2423_v8  ;;  %v2874_v4 = vld [vmem:[#allocation10 + $0x48] sm:$0xff] }
 0x108   :  { %1599 = vmatmul.bf16.vlgmr.msrb.gmra.mxu0 %v3148_v22 }
 0x109   :  { %1625 = vmatpush.bf16.msrb.mxu2 %v2495_v10  ;;  %1613 = vmatmul.bf16.vlgmr.msrb.gmra.mxu1 %v3150_v27  ;;  %v2867_v27 = vld [vmem:[#allocation10 + $0x10] sm:$0xff] }
 0x10a   :  { %1639 = vmatpush.bf16.msrb.mxu3 %v2559_v11  ;;  %1785 = vmatpush.bf16.msra.mxu0 %v2872_v17 }
 0x10b   :  { %1799 = vmatpush.bf16.msra.mxu1 %v2880_v32 }
 0x10d   :  { %1626 = vmatpush.bf16.msrb.mxu2 %v2487_v15 }
 0x10e   :  { %1640 = vmatpush.bf16.msrb.mxu3 %v2551_v16  ;;  %1786 = vmatpush.bf16.msra.mxu0 %v2871_v18 }
 0x10f   :  { %1800 = vmatpush.bf16.msra.mxu1 %v2879_v36 }
 0x110   :  { %1627 = vmatmul.bf16.vlgmr.msrb.gmra.mxu2 %v3154_v61  ;;  %v3171_v61 = vld [vmem:[%s3188_s4] sm:$0x3] }
 0x111   :  { %1641 = vmatmul.bf16.vlgmr.msrb.gmra.mxu3 %v3156_v0  ;;  %v779_v29 = vperm.slane %v3171_v61, 0  ;;  %v780_v9 = vperm.slane %v3171_v61, 1 }
 0x112   :  { %1787 = vmatpush.bf16.msra.mxu0 %v2870_v19 }
 0x113   :  { %1801 = vmatpush.bf16.msra.mxu1 %v2878_v41  ;;  %v2893_v41 = vld [vmem:[%s3190_s6] ss:$0 sm:$0xff] }
 0x116   :  { %1788 = vmatpush.bf16.msra.mxu0 %v2869_v20 }
 0x117   :  { %1802 = vmatpush.bf16.msra.mxu1 %v2877_v47 }
 0x11a   :  { %1789 = vmatpush.bf16.msra.mxu0 %v2868_v21 }
 0x11b   :  { %1803 = vmatpush.bf16.msra.mxu1 %v2876_v31 }
 0x11e   :  { %1790 = vmatpush.bf16.msra.mxu0 %v2867_v27 }
 0x11f   :  { %1804 = vmatpush.bf16.msra.mxu1 %v2875_v57 }
 0x122   :  { %1791 = vmatpush.bf16.msra.mxu0 %v2866_v24 }
 0x123   :  { %1805 = vmatpush.bf16.msra.mxu1 %v2874_v4 }
 0x126   :  { %1792 = vmatpush.bf16.msra.mxu0 %v2865_v28 }
 0x127   :  { %1806 = vmatpush.bf16.msra.mxu1 %v2873_v54 }
 0x144   :  { %v1432_v22 = vpop.f32.mrf.mxu0 }
 0x145   :  { %v1446_v23 = vpop.f32.mrf.mxu1  ;;  %v1433_v33 = vadd.f32 %v1432_v22, %v779_v29 }
 0x147   :  { %v1447_v37 = vadd.f32 %v1446_v23, %v1433_v33 }
 0x14c   :  { %v1434_v25 = vpop.f32.mrf.mxu0 }
 0x14d   :  { %v1448_v0 = vpop.f32.mrf.mxu1  ;;  %v1435_v38 = vadd.f32 %v1434_v25, %v779_v29 }
 0x14f   :  { %v1449_v43 = vadd.f32 %v1448_v0, %v1435_v38 }
 0x152   :  { %v1474_v30 = vpop.f32.mrf.mxu3 }
 0x153   :  { %v1460_v2 = vpop.f32.mrf.mxu2 }
 0x154   :  { %v1461_v40 = vadd.f32 %v1460_v2, %v1447_v37 }
 0x156   :  { %v1475_v45 = vadd.f32 %v1474_v30, %v1461_v40 }
 0x15a   :  { %v1476_v42 = vpop.f32.mrf.mxu3 }
 0x15b   :  { %v1462_v39 = vpop.f32.mrf.mxu2 }
 0x15c   :  { %v1463_v46 = vadd.f32 %v1462_v39, %v1449_v43 }
 0x15e   :  { %v1477_v26 = vadd.f32 %v1476_v42, %v1463_v46 }
 0x165   :  { %v1488_v34 = vpop.f32.mrf.mxu0  ;;  %v1502_v35 = vpop.f32.mrf.mxu1 }
 0x166   :  { %v1489_v48 = vadd.f32 %v1488_v34, %v1475_v45 }
 0x168   :  { %v1503_v52 = vadd.f32 %v1502_v35, %v1489_v48 }
 0x16d   :  { %v1490_v44 = vpop.f32.mrf.mxu0  ;;  %v1504_v49 = vpop.f32.mrf.mxu1 }
 0x16e   :  { %v1491_v53 = vadd.f32 %v1490_v44, %v1477_v26 }
 0x170   :  { %v1505_v58 = vadd.f32 %v1504_v49, %v1491_v53 }
 0x172   :  { %v1516_v50 = vpop.f32.mrf.mxu2  ;;  %v1530_v51 = vpop.f32.mrf.mxu3 }
 0x173   :  { %v1517_v56 = vadd.f32 %v1516_v50, %v1503_v52 }
 0x175   :  { %v1544_v55 = vpop.f32.mrf.mxu0  ;;  %v1531_v62 = vadd.f32 %v1530_v51, %v1517_v56  ;;  %v1558_v63 = vpop.f32.mrf.mxu1 }
 0x176   :  { %v1545_v12 = vadd.f32 %v1544_v55, %v780_v9 }
 0x177   :  { %v1647_v6 = vmax.f32 %v1531_v62, 0.0 }
 0x178   :  { %v1559_v14 = vadd.f32 %v1558_v63, %v1545_v12 }
 0x17a   :  { %v1518_v59 = vpop.f32.mrf.mxu2  ;;  %v1532_v3 = vpop.f32.mrf.mxu3 }
 0x17b   :  { %v1519_v1 = vadd.f32 %v1518_v59, %v1505_v58 }
 0x17d   :  { %v1533_v5 = vadd.f32 %v1532_v3, %v1519_v1  ;;  %v1546_v8 = vpop.f32.mrf.mxu0  ;;  %v1560_v13 = vpop.f32.mrf.mxu1 }
 0x17e   :  { %v1547_v15 = vadd.f32 %v1546_v8, %v780_v9 }
 0x17f   :  { %v1649_v7 = vmax.f32 %v1533_v5, 0.0 }
 0x180   :  { %v1561_v20 = vadd.f32 %v1560_v13, %v1547_v15 }
 0x181   :  { %v1651_v10 = vpack.c.bf16 %v1649_v7, %v1647_v6 }
 0x182   :  { %v1572_v11 = vpop.f32.mrf.mxu2  ;;  %v1586_v60 = vpop.f32.mrf.mxu3 }
 0x183   :  { %1793 = vmatmul.bf16.vlgmr.msra.gmra.mxu0 %v1651_v10  ;;  %v1573_v17 = vadd.f32 %v1572_v11, %v1559_v14 }
 0x185   :  { %v1600_v16 = vpop.f32.mrf.mxu0  ;;  %v1587_v22 = vadd.f32 %v1586_v60, %v1573_v17 }
 0x186   :  { %v1614_v23 = vpop.f32.mrf.mxu1 }
 0x187   :  { %v1601_v27 = vadd.f32 %v1600_v16, %v1587_v22 }
 0x189   :  { %v1615_v2 = vadd.f32 %v1614_v23, %v1601_v27 }
 0x18a   :  { %v1574_v18 = vpop.f32.mrf.mxu2  ;;  %v1588_v19 = vpop.f32.mrf.mxu3 }
 0x18b   :  { %v1575_v21 = vadd.f32 %v1574_v18, %v1561_v20 }
 0x18d   :  { %v1589_v24 = vadd.f32 %v1588_v19, %v1575_v21  ;;  %v1602_v25 = vpop.f32.mrf.mxu0 }
 0x18e   :  { %v1616_v30 = vpop.f32.mrf.mxu1 }
 0x18f   :  { %v1603_v28 = vadd.f32 %v1602_v25, %v1589_v24 }
 0x191   :  { %v1617_v32 = vadd.f32 %v1616_v30, %v1603_v28 }
 0x193   :  { %v1628_v61 = vpop.f32.mrf.mxu2 }
 0x194   :  { %v1642_v0 = vpop.f32.mrf.mxu3  ;;  %v1629_v29 = vadd.f32 %v1628_v61, %v1615_v2 }
 0x196   :  { %v1643_v34 = vadd.f32 %v1642_v0, %v1629_v29 }
 0x198   :  { %v1648_v38 = vmax.f32 %v1643_v34, 0.0 }
 0x19b   :  { %v1630_v33 = vpop.f32.mrf.mxu2 }
 0x19c   :  { %v1631_v35 = vadd.f32 %v1630_v33, %v1617_v32  ;;  %v1644_v36 = vpop.f32.mrf.mxu3 }
 0x19e   :  { %v1645_v37 = vadd.f32 %v1644_v36, %v1631_v35 }
 0x1a0   :  { %v1650_v39 = vmax.f32 %v1645_v37, 0.0 }
 0x1a2   :  { %v1652_v40 = vpack.c.bf16 %v1650_v39, %v1648_v38 }
 0x1a4   :  { %1807 = vmatmul.bf16.vlgmr.msra.gmra.mxu1 %v1652_v40 }
 0x200   :  { %v1794_v42 = vpop.f32.mrf.mxu0 }
 0x201   :  { %v1795_v43 = vadd.f32 %v2893_v41, %v1794_v42 }
 0x208   :  { %v1796_v46 = vpop.f32.mrf.mxu0 }
 0x209   :  { %v1797_v47 = vadd.f32 %v2893_v41, %v1796_v46 }
 0x221   :  { %v1808_v44 = vpop.f32.mrf.mxu1 }
 0x222   :  { %v1809_v45 = vadd.f32 %v1808_v44, %v1795_v43 }
 0x224   :  { %1813 = vst [vmem:[#allocation11] sm:$0xff] %v1809_v45 }
 0x229   :  { %v1810_v48 = vpop.f32.mrf.mxu1 }
 0x22a   :  { %v1811_v49 = vadd.f32 %v1810_v48, %v1797_v47 }
 0x22c   :  { %1814 = vst [vmem:[#allocation11 + $0x8] sm:$0xff] %v1811_v49 }
 0x22d   :  { %1827 = dma.vmem_to_hbm [thread:$0]  %s1820_s8, 256, %s1822_s11, [#allocation4], %s3050_s13, %s3050_s13, %s3051_s14  }
 0x22e   :  { %3044 = dma.done.wait [#allocation4], 256  }
 0x22f   :  { %3045 = vsyncadd [#allocation4], 4294967040 }
 0x230   :  { %1832 = vsyncpa [#allocation3], 1 }
 0x231   :  { %1833 = vsyncpa [#allocation6], 1 }
 0x232   :  { %1834 = vsyncpa [#allocation9], 1 }
 0x233   :  { %1835 = vsyncpa [#allocation4], 1 }

</bundles_post_ra>
